<compile_context>
chip_gen: v5e
topology: v5e:2x2
jax: 0.10.0
libtpu: 0.0.40
codegen_flags: <defaults>
</compile_context>

<pallas_src>
import numpy as np
import jax
import jax.numpy as jnp
from jax import lax
from jax.experimental import pallas as pl
from jax.experimental.pallas import tpu as pltpu


def _tap_masks(H, W):
    """(9, 1, HW) f32 validity masks for the 3x3 taps (compile-time constants)."""
    HW = H * W
    q = np.arange(HW)
    r, c = q // W, q % W
    m = np.zeros((9, 1, HW), np.float32)
    for kh in range(3):
        for kw in range(3):
            dh, dw = kh - 1, kw - 1
            valid = (r + dh >= 0) & (r + dh < H) & (c + dw >= 0) & (c + dw < W)
            m[kh * 3 + kw, 0] = valid.astype(np.float32)
    return m


def _make_resconv3_kernel(N, C, H, W, Bt, eps, cache_y):
    C2, HW = 2 * C, H * W
    count = float(N * HW)
    shifts = [(kh - 1) * W + (kw - 1) for kh in range(3) for kw in range(3)]

    def compute_y(b, x_ref, w_ref, m_ref, bias_c):
        # conv3x3 (+ residual folded into center-tap weights) for image b.
        x_b = x_ref[b]                                            # (C, HW)
        acc = jnp.dot(w_ref[4], x_b, preferred_element_type=jnp.float32)
        for t in range(9):
            if t == 4:
                continue
            # tap[q] = x[q + s] for in-image positions, else 0 (mask).
            tap = pltpu.roll(x_b, shift=(-shifts[t]) % HW, axis=1) * m_ref[t]
            acc = acc + jnp.dot(w_ref[t], tap,
                                preferred_element_type=jnp.float32)
        return acc + bias_c                                       # (C2, HW)

    def kernel(x_ref, w_ref, m_ref, prm_ref, out_ref, sum_ref, sq_ref,
               y_ref=None):
        p = pl.program_id(0)       # 0: batch stats, 1: normalize + write
        nb = pl.program_id(1)      # batch block

        @pl.when(jnp.logical_and(p == 0, nb == 0))
        def _init():
            sum_ref[...] = jnp.zeros_like(sum_ref)
            sq_ref[...] = jnp.zeros_like(sq_ref)

        bias_c = prm_ref[0]                                       # (C2, 1)

        @pl.when(p == 0)
        def _stats():
            s_acc = jnp.zeros((C2, 1), jnp.float32)
            q_acc = jnp.zeros((C2, 1), jnp.float32)
            for b in range(Bt):
                y = compute_y(b, x_ref, w_ref, m_ref, bias_c)
                if cache_y:
                    y_ref[nb * Bt + b] = y
                s_acc = s_acc + jnp.sum(y, axis=1, keepdims=True)
                q_acc = q_acc + jnp.sum(y * y, axis=1, keepdims=True)
            sum_ref[...] += s_acc
            sq_ref[...] += q_acc

        @pl.when(p == 1)
        def _write():
            # Fold batch stats + gamma/beta into per-channel (a, b) exactly once.
            @pl.when(nb == 0)
            def _fold():
                inv = 1.0 / count
                mean = sum_ref[...] * inv
                # TODO(synk): E[y^2]-E[y]^2 can cancel when |mean| >> std; switch
                # to a centered second pass over the y-cache if that regime matters.
                var = jnp.maximum(sq_ref[...] * inv - mean * mean, 0.0)
                a = prm_ref[1] * lax.rsqrt(var + eps)
                sum_ref[...] = a
                sq_ref[...] = prm_ref[2] - mean * a
            a = sum_ref[...]
            sh = sq_ref[...]
            for b in range(Bt):
                if cache_y:
                    y = y_ref[nb * Bt + b]
                else:
                    y = compute_y(b, x_ref, w_ref, m_ref, bias_c)
                out_ref[b] = jnp.maximum(y * a + sh, 0.0)

    return kernel


def res_conv3_forward(x_nchw, w_oihw, bias, gamma, beta, eps=1e-5):
    """x: (N, C, H, W) -> (N, 2C, H, W), matching PyTorch ResConv3 (train-mode BN)."""
    N, C, H, W = x_nchw.shape
    C2, HW = 2 * C, H * W
    assert w_oihw.shape == (C2, C, 3, 3)

    # Free reshapes: channel-first with flattened spatial on the lane axis.
    x2 = x_nchw.reshape(N, C, HW).astype(jnp.float32)
    # OIHW -> (9, 2C, C), tap index t = kh*3 + kw; fold the residual concat(x, x)
    # into the center tap so the kernel never materializes the skip tensor.
    w9 = jnp.transpose(w_oihw.astype(jnp.float32), (2, 3, 0, 1)).reshape(9, C2, C)
    w9 = w9.at[4].add(jnp.concatenate([jnp.eye(C, dtype=jnp.float32)] * 2, axis=0))
    # bias / gamma / beta packed into one operand (leading-dim indexed in-kernel).
    prm = jnp.stack([bias.reshape(C2, 1), gamma.reshape(C2, 1),
                     beta.reshape(C2, 1)]).astype(jnp.float32)     # (3, C2, 1)
    masks = jnp.asarray(_tap_masks(H, W))                          # (9, 1, HW)

    # --- VMEM budgeting (v7x has 64 MiB physical; v5e/v6e have 128 MiB) ------
    try:
        vmem_cap = int(pltpu.get_tpu_info().vmem_capacity_bytes)
    except Exception:
        vmem_cap = 64 * 1024 * 1024
    vmem_limit = int(min(vmem_cap * 3 // 4, 96 * 1024 * 1024))

    y_cache_bytes = N * C2 * HW * 4
    cache_y = y_cache_bytes <= vmem_limit // 3
    reserve = 4 * 1024 * 1024              # weights/masks/params/stats + slack
    avail = vmem_limit - (y_cache_bytes if cache_y else 0) - reserve
    per_image = 2 * (C + C2) * HW * 4      # double-buffered x + out blocks
    max_bt = int(max(1, min(32, avail // max(per_image, 1))))
    Bt = 1
    for cand in range(1, min(N, max_bt) + 1):
        if N % cand == 0:
            Bt = cand
    NB = N // Bt

    kernel = _make_resconv3_kernel(N, C, H, W, Bt, eps, cache_y)

    # Phase 1 does not need x when y is cached -> park its index on block 0
    # (no per-step re-DMA of x during the write phase).
    x_map = (lambda p, nb: (nb * (1 - p), 0, 0)) if cache_y \
        else (lambda p, nb: (nb, 0, 0))

    scratch = [pltpu.VMEM((C2, 1), jnp.float32),   # per-channel sum  -> BN scale a
               pltpu.VMEM((C2, 1), jnp.float32)]   # per-channel sumsq -> BN shift b
    if cache_y:
        scratch.append(pltpu.VMEM((N, C2, HW), jnp.float32))   # conv+skip cache

    out = pl.pallas_call(
        kernel,
        out_shape=jax.ShapeDtypeStruct((N, C2, HW), jnp.float32),
        grid_spec=pltpu.PrefetchScalarGridSpec(
            num_scalar_prefetch=0,
            grid=(2, NB),                          # (phase, batch block)
            in_specs=[
                pl.BlockSpec((Bt, C, HW), x_map),
                pl.BlockSpec((9, C2, C), lambda p, nb: (0, 0, 0)),
                pl.BlockSpec((9, 1, HW), lambda p, nb: (0, 0, 0)),
                pl.BlockSpec((3, C2, 1), lambda p, nb: (0, 0, 0)),
            ],
            # Phase 0 parks the output index on block 0: the block index never
            # changes during phase 0, so nothing is flushed until phase 1 has
            # fully overwritten block 0; phase 1 writes block nb for real.
            out_specs=pl.BlockSpec((Bt, C2, HW), lambda p, nb: (p * nb, 0, 0)),
            scratch_shapes=scratch,
        ),
        # Fully sequential: phase 1 consumes stats accumulated in phase 0 via
        # persistent VMEM scratch on a single core.
        # TODO(synk): on v7x, shard the batch axis over the 2 TensorCores with
        # per-core partial (sum, sumsq) and an explicit combine step.
        compiler_params=pltpu.CompilerParams(
            dimension_semantics=("arbitrary", "arbitrary"),
            vmem_limit_bytes=vmem_limit),
    )(x2, w9, masks, prm)

    return out.reshape(N, C2, H, W)


# --------------------------- pure-JAX reference ------------------------------
def res_conv3_reference(x, w, bias, gamma, beta, eps=1e-5):
    conv = lax.conv_general_dilated(
        x.astype(jnp.float32), w.astype(jnp.float32),
        window_strides=(1, 1), padding="SAME",
        dimension_numbers=("NCHW", "OIHW", "NCHW"))
    y = conv + bias[None, :, None, None] + jnp.concatenate([x, x], axis=1)
    mean = jnp.mean(y, axis=(0, 2, 3), keepdims=True)
    var = jnp.mean((y - mean) ** 2, axis=(0, 2, 3), keepdims=True)
    yn = (y - mean) * lax.rsqrt(var + eps)
    yn = yn * gamma[None, :, None, None] + beta[None, :, None, None]
    return jnp.maximum(yn, 0.0)


if __name__ == "__main__":
    key = jax.random.PRNGKey(0)
    k_x, k_w, k_b = jax.random.split(key, 3)

    N, C, H, W = 2, 4, 16, 16
    C2 = 2 * C

    x = jax.random.normal(k_x, (N, C, H, W), dtype=jnp.float32)
    # Conv2d(C -> 2C, 3x3, padding=1) params (deterministic synthetic init).
    w_oihw = 0.1 * jax.random.normal(k_w, (C2, C, 3, 3), dtype=jnp.float32)
    bias = 0.1 * jax.random.normal(k_b, (C2,), dtype=jnp.float32)
    # BatchNorm2d default init: weight=1, bias=0 (training-mode batch stats).
    gamma = jnp.ones((C2,), dtype=jnp.float32)
    beta = jnp.zeros((C2,), dtype=jnp.float32)

    out = res_conv3_forward(x, w_oihw, bias, gamma, beta)
    out = jax.block_until_ready(out)

    ref = res_conv3_reference(x, w_oihw, bias, gamma, beta)
    assert out.shape == (N, C2, H, W)
    max_err = float(jnp.max(jnp.abs(out - ref)))
    assert jnp.allclose(out, ref, rtol=1e-4, atol=1e-4), max_err

    print("KERNEL_OK")
</pallas_src>

<mosaic_0001>
module attributes {stable_mosaic.version = 11 : i64} {
  func.func @kernel(%arg0: i32, %arg1: i32, %arg2: memref<2x4x256xf32, #tpu.memory_space<vmem>>, %arg3: memref<9x8x4xf32, #tpu.memory_space<vmem>>, %arg4: memref<9x1x256xf32, #tpu.memory_space<vmem>>, %arg5: memref<3x8x1xf32, #tpu.memory_space<vmem>>, %arg6: memref<2x8x256xf32, #tpu.memory_space<vmem>>, %arg7: memref<8x1xf32, #tpu.memory_space<vmem>>, %arg8: memref<8x1xf32, #tpu.memory_space<vmem>>, %arg9: memref<2x8x256xf32, #tpu.memory_space<vmem>>) attributes {dimension_semantics = [#tpu.dimension_semantics<arbitrary>, #tpu.dimension_semantics<arbitrary>], iteration_bounds = array<i64: 2, 1>, scalar_prefetch = 0 : i64, scratch_operands = 3 : i64, tpu.core_type = #tpu.core_type<tc>, window_params = [{transform_indices = @transform_0, window_bounds = array<i64: 2, 4, 256>}, {pipeline_mode = #tpu.pipeline_mode<synchronous>, transform_indices = @transform_1, window_bounds = array<i64: 9, 8, 4>}, {pipeline_mode = #tpu.pipeline_mode<synchronous>, transform_indices = @transform_2, window_bounds = array<i64: 9, 1, 256>}, {pipeline_mode = #tpu.pipeline_mode<synchronous>, transform_indices = @transform_3, window_bounds = array<i64: 3, 8, 1>}, {transform_indices = @transform_4, window_bounds = array<i64: 2, 8, 256>}]} {
    %c0_i32 = arith.constant 0 : i32
    %0 = arith.cmpi eq, %arg0, %c0_i32 : i32
    %c0_i32_0 = arith.constant 0 : i32
    %1 = arith.cmpi eq, %arg1, %c0_i32_0 : i32
    %2 = arith.andi %0, %1 : i1
    %3 = arith.extui %2 : i1 to i32
    %c0_i32_1 = arith.constant 0 : i32
    %4 = arith.cmpi ne, %3, %c0_i32_1 : i32
    scf.if %4 {
      %cst = arith.constant 0.000000e+00 : f32
      %13 = vector.broadcast %cst : f32 to vector<8x1xf32>
      %c0_7 = arith.constant 0 : index
      %c0_8 = arith.constant 0 : index
      %14 = vector.load %arg7[%c0_7, %c0_8] : memref<8x1xf32, #tpu.memory_space<vmem>>, vector<8x1xf32>
      tpu.vector_store %arg7[%c0_7, %c0_8], %13 {strides = array<i32>} : memref<8x1xf32, #tpu.memory_space<vmem>>, vector<8x1xf32>,
      %cst_9 = arith.constant 0.000000e+00 : f32
      %15 = vector.broadcast %cst_9 : f32 to vector<8x1xf32>
      %c0_10 = arith.constant 0 : index
      %c0_11 = arith.constant 0 : index
      %16 = vector.load %arg8[%c0_10, %c0_11] : memref<8x1xf32, #tpu.memory_space<vmem>>, vector<8x1xf32>
      tpu.vector_store %arg8[%c0_10, %c0_11], %15 {strides = array<i32>} : memref<8x1xf32, #tpu.memory_space<vmem>>, vector<8x1xf32>,
    } else {
    }
    %c0 = arith.constant 0 : index
    %c0_2 = arith.constant 0 : index
    %c0_3 = arith.constant 0 : index
    %5 = vector.load %arg5[%c0, %c0_2, %c0_3] : memref<3x8x1xf32, #tpu.memory_space<vmem>>, vector<1x8x1xf32>
    %6 = vector.shape_cast %5 : vector<1x8x1xf32> to vector<8x1xf32>
    %c0_i32_4 = arith.constant 0 : i32
    %7 = arith.cmpi eq, %arg0, %c0_i32_4 : i32
    %8 = arith.extui %7 : i1 to i32
    %c0_i32_5 = arith.constant 0 : i32
    %9 = arith.cmpi ne, %8, %c0_i32_5 : i32
    scf.if %9 {
      %cst = arith.constant 0.000000e+00 : f32
      %13 = vector.broadcast %cst : f32 to vector<8x1xf32>
      %cst_7 = arith.constant 0.000000e+00 : f32
      %14 = vector.broadcast %cst_7 : f32 to vector<8x1xf32>
      %c0_8 = arith.constant 0 : index
      %c0_9 = arith.constant 0 : index
      %c0_10 = arith.constant 0 : index
      %15 = vector.load %arg2[%c0_8, %c0_9, %c0_10] : memref<2x4x256xf32, #tpu.memory_space<vmem>>, vector<1x4x256xf32>
      %16 = vector.shape_cast %15 : vector<1x4x256xf32> to vector<4x256xf32>
      %c4 = arith.constant 4 : index
      %c0_11 = arith.constant 0 : index
      %c0_12 = arith.constant 0 : index
      %17 = vector.load %arg3[%c4, %c0_11, %c0_12] : memref<9x8x4xf32, #tpu.memory_space<vmem>>, vector<1x8x4xf32>
      %18 = vector.shape_cast %17 : vector<1x8x4xf32> to vector<8x4xf32>
      %cst_13 = arith.constant dense<0.000000e+00> : vector<8x256xf32>
      %19 = tpu.matmul %18, %16, %cst_13 {dimension_numbers = #tpu.dot_dimension_numbers<[1], [0], [0], [1], [0, 0, 1, 1], [], []>} : vector<8x4xf32>, vector<4x256xf32>, vector<8x256xf32> -> vector<8x256xf32>
      %c17_i32 = arith.constant 17 : i32
      %20 = tpu.dynamic_rotate %16 by %c17_i32 dim 1 : vector<4x256xf32>, i32 -> vector<4x256xf32>
      %c0_14 = arith.constant 0 : index
      %c0_15 = arith.constant 0 : index
      %c0_16 = arith.constant 0 : index
      %21 = vector.load %arg4[%c0_14, %c0_15, %c0_16] : memref<9x1x256xf32, #tpu.memory_space<vmem>>, vector<1x1x256xf32>
      %22 = vector.shape_cast %21 : vector<1x1x256xf32> to vector<1x256xf32>
      %23 = vector.broadcast %22 : vector<1x256xf32> to vector<4x256xf32>
      %24 = arith.mulf %20, %23 : vector<4x256xf32>
      %c0_17 = arith.constant 0 : index
      %c0_18 = arith.constant 0 : index
      %c0_19 = arith.constant 0 : index
      %25 = vector.load %arg3[%c0_17, %c0_18, %c0_19] : memref<9x8x4xf32, #tpu.memory_space<vmem>>, vector<1x8x4xf32>
      %26 = vector.shape_cast %25 : vector<1x8x4xf32> to vector<8x4xf32>
      %cst_20 = arith.constant dense<0.000000e+00> : vector<8x256xf32>
      %27 = tpu.matmul %26, %24, %cst_20 {dimension_numbers = #tpu.dot_dimension_numbers<[1], [0], [0], [1], [0, 0, 1, 1], [], []>} : vector<8x4xf32>, vector<4x256xf32>, vector<8x256xf32> -> vector<8x256xf32>
      %28 = arith.addf %19, %27 : vector<8x256xf32>
      %c16_i32 = arith.constant 16 : i32
      %29 = tpu.dynamic_rotate %16 by %c16_i32 dim 1 : vector<4x256xf32>, i32 -> vector<4x256xf32>
      %c1 = arith.constant 1 : index
      %c0_21 = arith.constant 0 : index
      %c0_22 = arith.constant 0 : index
      %30 = vector.load %arg4[%c1, %c0_21, %c0_22] : memref<9x1x256xf32, #tpu.memory_space<vmem>>, vector<1x1x256xf32>
      %31 = vector.shape_cast %30 : vector<1x1x256xf32> to vector<1x256xf32>
      %32 = vector.broadcast %31 : vector<1x256xf32> to vector<4x256xf32>
      %33 = arith.mulf %29, %32 : vector<4x256xf32>
      %c1_23 = arith.constant 1 : index
      %c0_24 = arith.constant 0 : index
      %c0_25 = arith.constant 0 : index
      %34 = vector.load %arg3[%c1_23, %c0_24, %c0_25] : memref<9x8x4xf32, #tpu.memory_space<vmem>>, vector<1x8x4xf32>
      %35 = vector.shape_cast %34 : vector<1x8x4xf32> to vector<8x4xf32>
      %cst_26 = arith.constant dense<0.000000e+00> : vector<8x256xf32>
      %36 = tpu.matmul %35, %33, %cst_26 {dimension_numbers = #tpu.dot_dimension_numbers<[1], [0], [0], [1], [0, 0, 1, 1], [], []>} : vector<8x4xf32>, vector<4x256xf32>, vector<8x256xf32> -> vector<8x256xf32>
      %37 = arith.addf %28, %36 : vector<8x256xf32>
      %c15_i32 = arith.constant 15 : i32
      %38 = tpu.dynamic_rotate %16 by %c15_i32 dim 1 : vector<4x256xf32>, i32 -> vector<4x256xf32>
      %c2 = arith.constant 2 : index
      %c0_27 = arith.constant 0 : index
      %c0_28 = arith.constant 0 : index
      %39 = vector.load %arg4[%c2, %c0_27, %c0_28] : memref<9x1x256xf32, #tpu.memory_space<vmem>>, vector<1x1x256xf32>
      %40 = vector.shape_cast %39 : vector<1x1x256xf32> to vector<1x256xf32>
      %41 = vector.broadcast %40 : vector<1x256xf32> to vector<4x256xf32>
      %42 = arith.mulf %38, %41 : vector<4x256xf32>
      %c2_29 = arith.constant 2 : index
      %c0_30 = arith.constant 0 : index
      %c0_31 = arith.constant 0 : index
      %43 = vector.load %arg3[%c2_29, %c0_30, %c0_31] : memref<9x8x4xf32, #tpu.memory_space<vmem>>, vector<1x8x4xf32>
      %44 = vector.shape_cast %43 : vector<1x8x4xf32> to vector<8x4xf32>
      %cst_32 = arith.constant dense<0.000000e+00> : vector<8x256xf32>
      %45 = tpu.matmul %44, %42, %cst_32 {dimension_numbers = #tpu.dot_dimension_numbers<[1], [0], [0], [1], [0, 0, 1, 1], [], []>} : vector<8x4xf32>, vector<4x256xf32>, vector<8x256xf32> -> vector<8x256xf32>
      %46 = arith.addf %37, %45 : vector<8x256xf32>
      %c1_i32_33 = arith.constant 1 : i32
      %47 = tpu.dynamic_rotate %16 by %c1_i32_33 dim 1 : vector<4x256xf32>, i32 -> vector<4x256xf32>
      %c3 = arith.constant 3 : index
      %c0_34 = arith.constant 0 : index
      %c0_35 = arith.constant 0 : index
      %48 = vector.load %arg4[%c3, %c0_34, %c0_35] : memref<9x1x256xf32, #tpu.memory_space<vmem>>, vector<1x1x256xf32>
      %49 = vector.shape_cast %48 : vector<1x1x256xf32> to vector<1x256xf32>
      %50 = vector.broadcast %49 : vector<1x256xf32> to vector<4x256xf32>
      %51 = arith.mulf %47, %50 : vector<4x256xf32>
      %c3_36 = arith.constant 3 : index
      %c0_37 = arith.constant 0 : index
      %c0_38 = arith.constant 0 : index
      %52 = vector.load %arg3[%c3_36, %c0_37, %c0_38] : memref<9x8x4xf32, #tpu.memory_space<vmem>>, vector<1x8x4xf32>
      %53 = vector.shape_cast %52 : vector<1x8x4xf32> to vector<8x4xf32>
      %cst_39 = arith.constant dense<0.000000e+00> : vector<8x256xf32>
      %54 = tpu.matmul %53, %51, %cst_39 {dimension_numbers = #tpu.dot_dimension_numbers<[1], [0], [0], [1], [0, 0, 1, 1], [], []>} : vector<8x4xf32>, vector<4x256xf32>, vector<8x256xf32> -> vector<8x256xf32>
      %55 = arith.addf %46, %54 : vector<8x256xf32>
      %c255_i32 = arith.constant 255 : i32
      %56 = tpu.dynamic_rotate %16 by %c255_i32 dim 1 : vector<4x256xf32>, i32 -> vector<4x256xf32>
      %c5 = arith.constant 5 : index
      %c0_40 = arith.constant 0 : index
      %c0_41 = arith.constant 0 : index
      %57 = vector.load %arg4[%c5, %c0_40, %c0_41] : memref<9x1x256xf32, #tpu.memory_space<vmem>>, vector<1x1x256xf32>
      %58 = vector.shape_cast %57 : vector<1x1x256xf32> to vector<1x256xf32>
      %59 = vector.broadcast %58 : vector<1x256xf32> to vector<4x256xf32>
      %60 = arith.mulf %56, %59 : vector<4x256xf32>
      %c5_42 = arith.constant 5 : index
      %c0_43 = arith.constant 0 : index
      %c0_44 = arith.constant 0 : index
      %61 = vector.load %arg3[%c5_42, %c0_43, %c0_44] : memref<9x8x4xf32, #tpu.memory_space<vmem>>, vector<1x8x4xf32>
      %62 = vector.shape_cast %61 : vector<1x8x4xf32> to vector<8x4xf32>
      %cst_45 = arith.constant dense<0.000000e+00> : vector<8x256xf32>
      %63 = tpu.matmul %62, %60, %cst_45 {dimension_numbers = #tpu.dot_dimension_numbers<[1], [0], [0], [1], [0, 0, 1, 1], [], []>} : vector<8x4xf32>, vector<4x256xf32>, vector<8x256xf32> -> vector<8x256xf32>
      %64 = arith.addf %55, %63 : vector<8x256xf32>
      %c241_i32 = arith.constant 241 : i32
      %65 = tpu.dynamic_rotate %16 by %c241_i32 dim 1 : vector<4x256xf32>, i32 -> vector<4x256xf32>
      %c6 = arith.constant 6 : index
      %c0_46 = arith.constant 0 : index
      %c0_47 = arith.constant 0 : index
      %66 = vector.load %arg4[%c6, %c0_46, %c0_47] : memref<9x1x256xf32, #tpu.memory_space<vmem>>, vector<1x1x256xf32>
      %67 = vector.shape_cast %66 : vector<1x1x256xf32> to vector<1x256xf32>
      %68 = vector.broadcast %67 : vector<1x256xf32> to vector<4x256xf32>
      %69 = arith.mulf %65, %68 : vector<4x256xf32>
      %c6_48 = arith.constant 6 : index
      %c0_49 = arith.constant 0 : index
      %c0_50 = arith.constant 0 : index
      %70 = vector.load %arg3[%c6_48, %c0_49, %c0_50] : memref<9x8x4xf32, #tpu.memory_space<vmem>>, vector<1x8x4xf32>
      %71 = vector.shape_cast %70 : vector<1x8x4xf32> to vector<8x4xf32>
      %cst_51 = arith.constant dense<0.000000e+00> : vector<8x256xf32>
      %72 = tpu.matmul %71, %69, %cst_51 {dimension_numbers = #tpu.dot_dimension_numbers<[1], [0], [0], [1], [0, 0, 1, 1], [], []>} : vector<8x4xf32>, vector<4x256xf32>, vector<8x256xf32> -> vector<8x256xf32>
      %73 = arith.addf %64, %72 : vector<8x256xf32>
      %c240_i32 = arith.constant 240 : i32
      %74 = tpu.dynamic_rotate %16 by %c240_i32 dim 1 : vector<4x256xf32>, i32 -> vector<4x256xf32>
      %c7 = arith.constant 7 : index
      %c0_52 = arith.constant 0 : index
      %c0_53 = arith.constant 0 : index
      %75 = vector.load %arg4[%c7, %c0_52, %c0_53] : memref<9x1x256xf32, #tpu.memory_space<vmem>>, vector<1x1x256xf32>
      %76 = vector.shape_cast %75 : vector<1x1x256xf32> to vector<1x256xf32>
      %77 = vector.broadcast %76 : vector<1x256xf32> to vector<4x256xf32>
      %78 = arith.mulf %74, %77 : vector<4x256xf32>
      %c7_54 = arith.constant 7 : index
      %c0_55 = arith.constant 0 : index
      %c0_56 = arith.constant 0 : index
      %79 = vector.load %arg3[%c7_54, %c0_55, %c0_56] : memref<9x8x4xf32, #tpu.memory_space<vmem>>, vector<1x8x4xf32>
      %80 = vector.shape_cast %79 : vector<1x8x4xf32> to vector<8x4xf32>
      %cst_57 = arith.constant dense<0.000000e+00> : vector<8x256xf32>
      %81 = tpu.matmul %80, %78, %cst_57 {dimension_numbers = #tpu.dot_dimension_numbers<[1], [0], [0], [1], [0, 0, 1, 1], [], []>} : vector<8x4xf32>, vector<4x256xf32>, vector<8x256xf32> -> vector<8x256xf32>
      %82 = arith.addf %73, %81 : vector<8x256xf32>
      %c239_i32 = arith.constant 239 : i32
      %83 = tpu.dynamic_rotate %16 by %c239_i32 dim 1 : vector<4x256xf32>, i32 -> vector<4x256xf32>
      %c8 = arith.constant 8 : index
      %c0_58 = arith.constant 0 : index
      %c0_59 = arith.constant 0 : index
      %84 = vector.load %arg4[%c8, %c0_58, %c0_59] : memref<9x1x256xf32, #tpu.memory_space<vmem>>, vector<1x1x256xf32>
      %85 = vector.shape_cast %84 : vector<1x1x256xf32> to vector<1x256xf32>
      %86 = vector.broadcast %85 : vector<1x256xf32> to vector<4x256xf32>
      %87 = arith.mulf %83, %86 : vector<4x256xf32>
      %c8_60 = arith.constant 8 : index
      %c0_61 = arith.constant 0 : index
      %c0_62 = arith.constant 0 : index
      %88 = vector.load %arg3[%c8_60, %c0_61, %c0_62] : memref<9x8x4xf32, #tpu.memory_space<vmem>>, vector<1x8x4xf32>
      %89 = vector.shape_cast %88 : vector<1x8x4xf32> to vector<8x4xf32>
      %cst_63 = arith.constant dense<0.000000e+00> : vector<8x256xf32>
      %90 = tpu.matmul %89, %87, %cst_63 {dimension_numbers = #tpu.dot_dimension_numbers<[1], [0], [0], [1], [0, 0, 1, 1], [], []>} : vector<8x4xf32>, vector<4x256xf32>, vector<8x256xf32> -> vector<8x256xf32>
      %91 = arith.addf %82, %90 : vector<8x256xf32>
      %92 = vector.broadcast %6 : vector<8x1xf32> to vector<8x256xf32>
      %93 = arith.addf %91, %92 : vector<8x256xf32>
      %c2_i32 = arith.constant 2 : i32
      %94 = arith.muli %arg1, %c2_i32 : i32
      %c0_i32_64 = arith.constant 0 : i32
      %95 = arith.addi %94, %c0_i32_64 : i32
      %96 = arith.index_cast %95 : i32 to index
      %c0_65 = arith.constant 0 : index
      %c0_66 = arith.constant 0 : index
      %97 = vector.load %arg9[%96, %c0_65, %c0_66] : memref<2x8x256xf32, #tpu.memory_space<vmem>>, vector<1x8x256xf32>
      %98 = vector.shape_cast %97 : vector<1x8x256xf32> to vector<8x256xf32>
      %99 = vector.shape_cast %93 : vector<8x256xf32> to vector<1x8x256xf32>
      tpu.vector_store %arg9[%96, %c0_65, %c0_66], %99 {strides = array<i32>} : memref<2x8x256xf32, #tpu.memory_space<vmem>>, vector<1x8x256xf32>,
      %cst_67 = arith.constant dense<0.000000e+00> : vector<8xf32>
      %100 = vector.multi_reduction <add>, %93, %cst_67 [1] : vector<8x256xf32> to vector<8xf32>
      %101 = vector.shape_cast %100 : vector<8xf32> to vector<8x1xf32>
      %102 = arith.addf %13, %101 : vector<8x1xf32>
      %103 = arith.mulf %93, %93 : vector<8x256xf32>
      %cst_68 = arith.constant dense<0.000000e+00> : vector<8xf32>
      %104 = vector.multi_reduction <add>, %103, %cst_68 [1] : vector<8x256xf32> to vector<8xf32>
      %105 = vector.shape_cast %104 : vector<8xf32> to vector<8x1xf32>
      %106 = arith.addf %14, %105 : vector<8x1xf32>
      %c1_69 = arith.constant 1 : index
      %c0_70 = arith.constant 0 : index
      %c0_71 = arith.constant 0 : index
      %107 = vector.load %arg2[%c1_69, %c0_70, %c0_71] : memref<2x4x256xf32, #tpu.memory_space<vmem>>, vector<1x4x256xf32>
      %108 = vector.shape_cast %107 : vector<1x4x256xf32> to vector<4x256xf32>
      %c4_72 = arith.constant 4 : index
      %c0_73 = arith.constant 0 : index
      %c0_74 = arith.constant 0 : index
      %109 = vector.load %arg3[%c4_72, %c0_73, %c0_74] : memref<9x8x4xf32, #tpu.memory_space<vmem>>, vector<1x8x4xf32>
      %110 = vector.shape_cast %109 : vector<1x8x4xf32> to vector<8x4xf32>
      %cst_75 = arith.constant dense<0.000000e+00> : vector<8x256xf32>
      %111 = tpu.matmul %110, %108, %cst_75 {dimension_numbers = #tpu.dot_dimension_numbers<[1], [0], [0], [1], [0, 0, 1, 1], [], []>} : vector<8x4xf32>, vector<4x256xf32>, vector<8x256xf32> -> vector<8x256xf32>
      %c17_i32_76 = arith.constant 17 : i32
      %112 = tpu.dynamic_rotate %108 by %c17_i32_76 dim 1 : vector<4x256xf32>, i32 -> vector<4x256xf32>
      %c0_77 = arith.constant 0 : index
      %c0_78 = arith.constant 0 : index
      %c0_79 = arith.constant 0 : index
      %113 = vector.load %arg4[%c0_77, %c0_78, %c0_79] : memref<9x1x256xf32, #tpu.memory_space<vmem>>, vector<1x1x256xf32>
      %114 = vector.shape_cast %113 : vector<1x1x256xf32> to vector<1x256xf32>
      %115 = vector.broadcast %114 : vector<1x256xf32> to vector<4x256xf32>
      %116 = arith.mulf %112, %115 : vector<4x256xf32>
      %c0_80 = arith.constant 0 : index
      %c0_81 = arith.constant 0 : index
      %c0_82 = arith.constant 0 : index
      %117 = vector.load %arg3[%c0_80, %c0_81, %c0_82] : memref<9x8x4xf32, #tpu.memory_space<vmem>>, vector<1x8x4xf32>
      %118 = vector.shape_cast %117 : vector<1x8x4xf32> to vector<8x4xf32>
      %cst_83 = arith.constant dense<0.000000e+00> : vector<8x256xf32>
      %119 = tpu.matmul %118, %116, %cst_83 {dimension_numbers = #tpu.dot_dimension_numbers<[1], [0], [0], [1], [0, 0, 1, 1], [], []>} : vector<8x4xf32>, vector<4x256xf32>, vector<8x256xf32> -> vector<8x256xf32>
      %120 = arith.addf %111, %119 : vector<8x256xf32>
      %c16_i32_84 = arith.constant 16 : i32
      %121 = tpu.dynamic_rotate %108 by %c16_i32_84 dim 1 : vector<4x256xf32>, i32 -> vector<4x256xf32>
      %c1_85 = arith.constant 1 : index
      %c0_86 = arith.constant 0 : index
      %c0_87 = arith.constant 0 : index
      %122 = vector.load %arg4[%c1_85, %c0_86, %c0_87] : memref<9x1x256xf32, #tpu.memory_space<vmem>>, vector<1x1x256xf32>
      %123 = vector.shape_cast %122 : vector<1x1x256xf32> to vector<1x256xf32>
      %124 = vector.broadcast %123 : vector<1x256xf32> to vector<4x256xf32>
      %125 = arith.mulf %121, %124 : vector<4x256xf32>
      %c1_88 = arith.constant 1 : index
      %c0_89 = arith.constant 0 : index
      %c0_90 = arith.constant 0 : index
      %126 = vector.load %arg3[%c1_88, %c0_89, %c0_90] : memref<9x8x4xf32, #tpu.memory_space<vmem>>, vector<1x8x4xf32>
      %127 = vector.shape_cast %126 : vector<1x8x4xf32> to vector<8x4xf32>
      %cst_91 = arith.constant dense<0.000000e+00> : vector<8x256xf32>
      %128 = tpu.matmul %127, %125, %cst_91 {dimension_numbers = #tpu.dot_dimension_numbers<[1], [0], [0], [1], [0, 0, 1, 1], [], []>} : vector<8x4xf32>, vector<4x256xf32>, vector<8x256xf32> -> vector<8x256xf32>
      %129 = arith.addf %120, %128 : vector<8x256xf32>
      %c15_i32_92 = arith.constant 15 : i32
      %130 = tpu.dynamic_rotate %108 by %c15_i32_92 dim 1 : vector<4x256xf32>, i32 -> vector<4x256xf32>
      %c2_93 = arith.constant 2 : index
      %c0_94 = arith.constant 0 : index
      %c0_95 = arith.constant 0 : index
      %131 = vector.load %arg4[%c2_93, %c0_94, %c0_95] : memref<9x1x256xf32, #tpu.memory_space<vmem>>, vector<1x1x256xf32>
      %132 = vector.shape_cast %131 : vector<1x1x256xf32> to vector<1x256xf32>
      %133 = vector.broadcast %132 : vector<1x256xf32> to vector<4x256xf32>
      %134 = arith.mulf %130, %133 : vector<4x256xf32>
      %c2_96 = arith.constant 2 : index
      %c0_97 = arith.constant 0 : index
      %c0_98 = arith.constant 0 : index
      %135 = vector.load %arg3[%c2_96, %c0_97, %c0_98] : memref<9x8x4xf32, #tpu.memory_space<vmem>>, vector<1x8x4xf32>
      %136 = vector.shape_cast %135 : vector<1x8x4xf32> to vector<8x4xf32>
      %cst_99 = arith.constant dense<0.000000e+00> : vector<8x256xf32>
      %137 = tpu.matmul %136, %134, %cst_99 {dimension_numbers = #tpu.dot_dimension_numbers<[1], [0], [0], [1], [0, 0, 1, 1], [], []>} : vector<8x4xf32>, vector<4x256xf32>, vector<8x256xf32> -> vector<8x256xf32>
      %138 = arith.addf %129, %137 : vector<8x256xf32>
      %c1_i32_100 = arith.constant 1 : i32
      %139 = tpu.dynamic_rotate %108 by %c1_i32_100 dim 1 : vector<4x256xf32>, i32 -> vector<4x256xf32>
      %c3_101 = arith.constant 3 : index
      %c0_102 = arith.constant 0 : index
      %c0_103 = arith.constant 0 : index
      %140 = vector.load %arg4[%c3_101, %c0_102, %c0_103] : memref<9x1x256xf32, #tpu.memory_space<vmem>>, vector<1x1x256xf32>
      %141 = vector.shape_cast %140 : vector<1x1x256xf32> to vector<1x256xf32>
      %142 = vector.broadcast %141 : vector<1x256xf32> to vector<4x256xf32>
      %143 = arith.mulf %139, %142 : vector<4x256xf32>
      %c3_104 = arith.constant 3 : index
      %c0_105 = arith.constant 0 : index
      %c0_106 = arith.constant 0 : index
      %144 = vector.load %arg3[%c3_104, %c0_105, %c0_106] : memref<9x8x4xf32, #tpu.memory_space<vmem>>, vector<1x8x4xf32>
      %145 = vector.shape_cast %144 : vector<1x8x4xf32> to vector<8x4xf32>
      %cst_107 = arith.constant dense<0.000000e+00> : vector<8x256xf32>
      %146 = tpu.matmul %145, %143, %cst_107 {dimension_numbers = #tpu.dot_dimension_numbers<[1], [0], [0], [1], [0, 0, 1, 1], [], []>} : vector<8x4xf32>, vector<4x256xf32>, vector<8x256xf32> -> vector<8x256xf32>
      %147 = arith.addf %138, %146 : vector<8x256xf32>
      %c255_i32_108 = arith.constant 255 : i32
      %148 = tpu.dynamic_rotate %108 by %c255_i32_108 dim 1 : vector<4x256xf32>, i32 -> vector<4x256xf32>
      %c5_109 = arith.constant 5 : index
      %c0_110 = arith.constant 0 : index
      %c0_111 = arith.constant 0 : index
      %149 = vector.load %arg4[%c5_109, %c0_110, %c0_111] : memref<9x1x256xf32, #tpu.memory_space<vmem>>, vector<1x1x256xf32>
      %150 = vector.shape_cast %149 : vector<1x1x256xf32> to vector<1x256xf32>
      %151 = vector.broadcast %150 : vector<1x256xf32> to vector<4x256xf32>
      %152 = arith.mulf %148, %151 : vector<4x256xf32>
      %c5_112 = arith.constant 5 : index
      %c0_113 = arith.constant 0 : index
      %c0_114 = arith.constant 0 : index
      %153 = vector.load %arg3[%c5_112, %c0_113, %c0_114] : memref<9x8x4xf32, #tpu.memory_space<vmem>>, vector<1x8x4xf32>
      %154 = vector.shape_cast %153 : vector<1x8x4xf32> to vector<8x4xf32>
      %cst_115 = arith.constant dense<0.000000e+00> : vector<8x256xf32>
      %155 = tpu.matmul %154, %152, %cst_115 {dimension_numbers = #tpu.dot_dimension_numbers<[1], [0], [0], [1], [0, 0, 1, 1], [], []>} : vector<8x4xf32>, vector<4x256xf32>, vector<8x256xf32> -> vector<8x256xf32>
      %156 = arith.addf %147, %155 : vector<8x256xf32>
      %c241_i32_116 = arith.constant 241 : i32
      %157 = tpu.dynamic_rotate %108 by %c241_i32_116 dim 1 : vector<4x256xf32>, i32 -> vector<4x256xf32>
      %c6_117 = arith.constant 6 : index
      %c0_118 = arith.constant 0 : index
      %c0_119 = arith.constant 0 : index
      %158 = vector.load %arg4[%c6_117, %c0_118, %c0_119] : memref<9x1x256xf32, #tpu.memory_space<vmem>>, vector<1x1x256xf32>
      %159 = vector.shape_cast %158 : vector<1x1x256xf32> to vector<1x256xf32>
      %160 = vector.broadcast %159 : vector<1x256xf32> to vector<4x256xf32>
      %161 = arith.mulf %157, %160 : vector<4x256xf32>
      %c6_120 = arith.constant 6 : index
      %c0_121 = arith.constant 0 : index
      %c0_122 = arith.constant 0 : index
      %162 = vector.load %arg3[%c6_120, %c0_121, %c0_122] : memref<9x8x4xf32, #tpu.memory_space<vmem>>, vector<1x8x4xf32>
      %163 = vector.shape_cast %162 : vector<1x8x4xf32> to vector<8x4xf32>
      %cst_123 = arith.constant dense<0.000000e+00> : vector<8x256xf32>
      %164 = tpu.matmul %163, %161, %cst_123 {dimension_numbers = #tpu.dot_dimension_numbers<[1], [0], [0], [1], [0, 0, 1, 1], [], []>} : vector<8x4xf32>, vector<4x256xf32>, vector<8x256xf32> -> vector<8x256xf32>
      %165 = arith.addf %156, %164 : vector<8x256xf32>
      %c240_i32_124 = arith.constant 240 : i32
      %166 = tpu.dynamic_rotate %108 by %c240_i32_124 dim 1 : vector<4x256xf32>, i32 -> vector<4x256xf32>
      %c7_125 = arith.constant 7 : index
      %c0_126 = arith.constant 0 : index
      %c0_127 = arith.constant 0 : index
      %167 = vector.load %arg4[%c7_125, %c0_126, %c0_127] : memref<9x1x256xf32, #tpu.memory_space<vmem>>, vector<1x1x256xf32>
      %168 = vector.shape_cast %167 : vector<1x1x256xf32> to vector<1x256xf32>
      %169 = vector.broadcast %168 : vector<1x256xf32> to vector<4x256xf32>
      %170 = arith.mulf %166, %169 : vector<4x256xf32>
      %c7_128 = arith.constant 7 : index
      %c0_129 = arith.constant 0 : index
      %c0_130 = arith.constant 0 : index
      %171 = vector.load %arg3[%c7_128, %c0_129, %c0_130] : memref<9x8x4xf32, #tpu.memory_space<vmem>>, vector<1x8x4xf32>
      %172 = vector.shape_cast %171 : vector<1x8x4xf32> to vector<8x4xf32>
      %cst_131 = arith.constant dense<0.000000e+00> : vector<8x256xf32>
      %173 = tpu.matmul %172, %170, %cst_131 {dimension_numbers = #tpu.dot_dimension_numbers<[1], [0], [0], [1], [0, 0, 1, 1], [], []>} : vector<8x4xf32>, vector<4x256xf32>, vector<8x256xf32> -> vector<8x256xf32>
      %174 = arith.addf %165, %173 : vector<8x256xf32>
      %c239_i32_132 = arith.constant 239 : i32
      %175 = tpu.dynamic_rotate %108 by %c239_i32_132 dim 1 : vector<4x256xf32>, i32 -> vector<4x256xf32>
      %c8_133 = arith.constant 8 : index
      %c0_134 = arith.constant 0 : index
      %c0_135 = arith.constant 0 : index
      %176 = vector.load %arg4[%c8_133, %c0_134, %c0_135] : memref<9x1x256xf32, #tpu.memory_space<vmem>>, vector<1x1x256xf32>
      %177 = vector.shape_cast %176 : vector<1x1x256xf32> to vector<1x256xf32>
      %178 = vector.broadcast %177 : vector<1x256xf32> to vector<4x256xf32>
      %179 = arith.mulf %175, %178 : vector<4x256xf32>
      %c8_136 = arith.constant 8 : index
      %c0_137 = arith.constant 0 : index
      %c0_138 = arith.constant 0 : index
      %180 = vector.load %arg3[%c8_136, %c0_137, %c0_138] : memref<9x8x4xf32, #tpu.memory_space<vmem>>, vector<1x8x4xf32>
      %181 = vector.shape_cast %180 : vector<1x8x4xf32> to vector<8x4xf32>
      %cst_139 = arith.constant dense<0.000000e+00> : vector<8x256xf32>
      %182 = tpu.matmul %181, %179, %cst_139 {dimension_numbers = #tpu.dot_dimension_numbers<[1], [0], [0], [1], [0, 0, 1, 1], [], []>} : vector<8x4xf32>, vector<4x256xf32>, vector<8x256xf32> -> vector<8x256xf32>
      %183 = arith.addf %174, %182 : vector<8x256xf32>
      %184 = vector.broadcast %6 : vector<8x1xf32> to vector<8x256xf32>
      %185 = arith.addf %183, %184 : vector<8x256xf32>
      %c2_i32_140 = arith.constant 2 : i32
      %186 = arith.muli %arg1, %c2_i32_140 : i32
      %c1_i32_141 = arith.constant 1 : i32
      %187 = arith.addi %186, %c1_i32_141 : i32
      %188 = arith.index_cast %187 : i32 to index
      %c0_142 = arith.constant 0 : index
      %c0_143 = arith.constant 0 : index
      %189 = vector.load %arg9[%188, %c0_142, %c0_143] : memref<2x8x256xf32, #tpu.memory_space<vmem>>, vector<1x8x256xf32>
      %190 = vector.shape_cast %189 : vector<1x8x256xf32> to vector<8x256xf32>
      %191 = vector.shape_cast %185 : vector<8x256xf32> to vector<1x8x256xf32>
      tpu.vector_store %arg9[%188, %c0_142, %c0_143], %191 {strides = array<i32>} : memref<2x8x256xf32, #tpu.memory_space<vmem>>, vector<1x8x256xf32>,
      %cst_144 = arith.constant dense<0.000000e+00> : vector<8xf32>
      %192 = vector.multi_reduction <add>, %185, %cst_144 [1] : vector<8x256xf32> to vector<8xf32>
      %193 = vector.shape_cast %192 : vector<8xf32> to vector<8x1xf32>
      %194 = arith.addf %102, %193 : vector<8x1xf32>
      %195 = arith.mulf %185, %185 : vector<8x256xf32>
      %cst_145 = arith.constant dense<0.000000e+00> : vector<8xf32>
      %196 = vector.multi_reduction <add>, %195, %cst_145 [1] : vector<8x256xf32> to vector<8xf32>
      %197 = vector.shape_cast %196 : vector<8xf32> to vector<8x1xf32>
      %198 = arith.addf %106, %197 : vector<8x1xf32>
      %c0_146 = arith.constant 0 : index
      %c0_147 = arith.constant 0 : index
      %199 = vector.load %arg7[%c0_146, %c0_147] : memref<8x1xf32, #tpu.memory_space<vmem>>, vector<8x1xf32>
      %200 = arith.addf %199, %194 : vector<8x1xf32>
      %c0_148 = arith.constant 0 : index
      %c0_149 = arith.constant 0 : index
      %201 = vector.load %arg7[%c0_148, %c0_149] : memref<8x1xf32, #tpu.memory_space<vmem>>, vector<8x1xf32>
      tpu.vector_store %arg7[%c0_148, %c0_149], %200 {strides = array<i32>} : memref<8x1xf32, #tpu.memory_space<vmem>>, vector<8x1xf32>,
      %c0_150 = arith.constant 0 : index
      %c0_151 = arith.constant 0 : index
      %202 = vector.load %arg8[%c0_150, %c0_151] : memref<8x1xf32, #tpu.memory_space<vmem>>, vector<8x1xf32>
      %203 = arith.addf %202, %198 : vector<8x1xf32>
      %c0_152 = arith.constant 0 : index
      %c0_153 = arith.constant 0 : index
      %204 = vector.load %arg8[%c0_152, %c0_153] : memref<8x1xf32, #tpu.memory_space<vmem>>, vector<8x1xf32>
      tpu.vector_store %arg8[%c0_152, %c0_153], %203 {strides = array<i32>} : memref<8x1xf32, #tpu.memory_space<vmem>>, vector<8x1xf32>,
    } else {
    }
    %c1_i32 = arith.constant 1 : i32
    %10 = arith.cmpi eq, %arg0, %c1_i32 : i32
    %11 = arith.extui %10 : i1 to i32
    %c0_i32_6 = arith.constant 0 : i32
    %12 = arith.cmpi ne, %11, %c0_i32_6 : i32
    scf.if %12 {
      %c0_i32_7 = arith.constant 0 : i32
      %13 = arith.cmpi eq, %arg1, %c0_i32_7 : i32
      %14 = arith.extui %13 : i1 to i32
      %c0_i32_8 = arith.constant 0 : i32
      %15 = arith.cmpi ne, %14, %c0_i32_8 : i32
      scf.if %15 {
        %c0_26 = arith.constant 0 : index
        %c0_27 = arith.constant 0 : index
        %46 = vector.load %arg7[%c0_26, %c0_27] : memref<8x1xf32, #tpu.memory_space<vmem>>, vector<8x1xf32>
        %cst_28 = arith.constant 0.001953125 : f32
        %47 = vector.broadcast %cst_28 : f32 to vector<8x1xf32>
        %48 = arith.mulf %46, %47 : vector<8x1xf32>
        %c0_29 = arith.constant 0 : index
        %c0_30 = arith.constant 0 : index
        %49 = vector.load %arg8[%c0_29, %c0_30] : memref<8x1xf32, #tpu.memory_space<vmem>>, vector<8x1xf32>
        %cst_31 = arith.constant 0.001953125 : f32
        %50 = vector.broadcast %cst_31 : f32 to vector<8x1xf32>
        %51 = arith.mulf %49, %50 : vector<8x1xf32>
        %52 = arith.mulf %48, %48 : vector<8x1xf32>
        %53 = arith.subf %51, %52 : vector<8x1xf32>
        %cst_32 = arith.constant 0.000000e+00 : f32
        %54 = vector.broadcast %cst_32 : f32 to vector<8x1xf32>
        %55 = arith.maximumf %53, %54 : vector<8x1xf32>
        %c1_33 = arith.constant 1 : index
        %c0_34 = arith.constant 0 : index
        %c0_35 = arith.constant 0 : index
        %56 = vector.load %arg5[%c1_33, %c0_34, %c0_35] : memref<3x8x1xf32, #tpu.memory_space<vmem>>, vector<1x8x1xf32>
        %57 = vector.shape_cast %56 : vector<1x8x1xf32> to vector<8x1xf32>
        %cst_36 = arith.constant 9.99999974E-6 : f32
        %58 = vector.broadcast %cst_36 : f32 to vector<8x1xf32>
        %59 = arith.addf %55, %58 : vector<8x1xf32>
        %60 = math.rsqrt %59 : vector<8x1xf32>
        %61 = arith.mulf %57, %60 : vector<8x1xf32>
        %c0_37 = arith.constant 0 : index
        %c0_38 = arith.constant 0 : index
        %62 = vector.load %arg7[%c0_37, %c0_38] : memref<8x1xf32, #tpu.memory_space<vmem>>, vector<8x1xf32>
        tpu.vector_store %arg7[%c0_37, %c0_38], %61 {strides = array<i32>} : memref<8x1xf32, #tpu.memory_space<vmem>>, vector<8x1xf32>,
        %c2 = arith.constant 2 : index
        %c0_39 = arith.constant 0 : index
        %c0_40 = arith.constant 0 : index
        %63 = vector.load %arg5[%c2, %c0_39, %c0_40] : memref<3x8x1xf32, #tpu.memory_space<vmem>>, vector<1x8x1xf32>
        %64 = vector.shape_cast %63 : vector<1x8x1xf32> to vector<8x1xf32>
        %65 = arith.mulf %48, %61 : vector<8x1xf32>
        %66 = arith.subf %64, %65 : vector<8x1xf32>
        %c0_41 = arith.constant 0 : index
        %c0_42 = arith.constant 0 : index
        %67 = vector.load %arg8[%c0_41, %c0_42] : memref<8x1xf32, #tpu.memory_space<vmem>>, vector<8x1xf32>
        tpu.vector_store %arg8[%c0_41, %c0_42], %66 {strides = array<i32>} : memref<8x1xf32, #tpu.memory_space<vmem>>, vector<8x1xf32>,
      } else {
      }
      %c0_9 = arith.constant 0 : index
      %c0_10 = arith.constant 0 : index
      %16 = vector.load %arg7[%c0_9, %c0_10] : memref<8x1xf32, #tpu.memory_space<vmem>>, vector<8x1xf32>
      %c0_11 = arith.constant 0 : index
      %c0_12 = arith.constant 0 : index
      %17 = vector.load %arg8[%c0_11, %c0_12] : memref<8x1xf32, #tpu.memory_space<vmem>>, vector<8x1xf32>
      %c2_i32 = arith.constant 2 : i32
      %18 = arith.muli %arg1, %c2_i32 : i32
      %c0_i32_13 = arith.constant 0 : i32
      %19 = arith.addi %18, %c0_i32_13 : i32
      %20 = arith.index_cast %19 : i32 to index
      %c0_14 = arith.constant 0 : index
      %c0_15 = arith.constant 0 : index
      %21 = vector.load %arg9[%20, %c0_14, %c0_15] : memref<2x8x256xf32, #tpu.memory_space<vmem>>, vector<1x8x256xf32>
      %22 = vector.shape_cast %21 : vector<1x8x256xf32> to vector<8x256xf32>
      %23 = vector.broadcast %16 : vector<8x1xf32> to vector<8x256xf32>
      %24 = arith.mulf %22, %23 : vector<8x256xf32>
      %25 = vector.broadcast %17 : vector<8x1xf32> to vector<8x256xf32>
      %26 = arith.addf %24, %25 : vector<8x256xf32>
      %cst = arith.constant 0.000000e+00 : f32
      %27 = vector.broadcast %cst : f32 to vector<8x256xf32>
      %28 = arith.maximumf %26, %27 : vector<8x256xf32>
      %c0_16 = arith.constant 0 : index
      %c0_17 = arith.constant 0 : index
      %c0_18 = arith.constant 0 : index
      %29 = vector.load %arg6[%c0_16, %c0_17, %c0_18] : memref<2x8x256xf32, #tpu.memory_space<vmem>>, vector<1x8x256xf32>
      %30 = vector.shape_cast %29 : vector<1x8x256xf32> to vector<8x256xf32>
      %31 = vector.shape_cast %28 : vector<8x256xf32> to vector<1x8x256xf32>
      tpu.vector_store %arg6[%c0_16, %c0_17, %c0_18], %31 {strides = array<i32>} : memref<2x8x256xf32, #tpu.memory_space<vmem>>, vector<1x8x256xf32>,
      %c2_i32_19 = arith.constant 2 : i32
      %32 = arith.muli %arg1, %c2_i32_19 : i32
      %c1_i32_20 = arith.constant 1 : i32
      %33 = arith.addi %32, %c1_i32_20 : i32
      %34 = arith.index_cast %33 : i32 to index
      %c0_21 = arith.constant 0 : index
      %c0_22 = arith.constant 0 : index
      %35 = vector.load %arg9[%34, %c0_21, %c0_22] : memref<2x8x256xf32, #tpu.memory_space<vmem>>, vector<1x8x256xf32>
      %36 = vector.shape_cast %35 : vector<1x8x256xf32> to vector<8x256xf32>
      %37 = vector.broadcast %16 : vector<8x1xf32> to vector<8x256xf32>
      %38 = arith.mulf %36, %37 : vector<8x256xf32>
      %39 = vector.broadcast %17 : vector<8x1xf32> to vector<8x256xf32>
      %40 = arith.addf %38, %39 : vector<8x256xf32>
      %cst_23 = arith.constant 0.000000e+00 : f32
      %41 = vector.broadcast %cst_23 : f32 to vector<8x256xf32>
      %42 = arith.maximumf %40, %41 : vector<8x256xf32>
      %c1 = arith.constant 1 : index
      %c0_24 = arith.constant 0 : index
      %c0_25 = arith.constant 0 : index
      %43 = vector.load %arg6[%c1, %c0_24, %c0_25] : memref<2x8x256xf32, #tpu.memory_space<vmem>>, vector<1x8x256xf32>
      %44 = vector.shape_cast %43 : vector<1x8x256xf32> to vector<8x256xf32>
      %45 = vector.shape_cast %42 : vector<8x256xf32> to vector<1x8x256xf32>
      tpu.vector_store %arg6[%c1, %c0_24, %c0_25], %45 {strides = array<i32>} : memref<2x8x256xf32, #tpu.memory_space<vmem>>, vector<1x8x256xf32>,
    } else {
    }
    return
  }
  func.func @transform_0(%arg0: i32, %arg1: i32) -> (i32, i32, i32) {
    %c1_i32 = arith.constant 1 : i32
    %0 = arith.subi %c1_i32, %arg0 : i32
    %1 = arith.muli %arg1, %0 : i32
    %c0_i32 = arith.constant 0 : i32
    %c0_i32_0 = arith.constant 0 : i32
    %c0_i32_1 = arith.constant 0 : i32
    return %1, %c0_i32, %c0_i32_0 : i32, i32, i32
  }
  func.func @transform_1(%arg0: i32, %arg1: i32) -> (i32, i32, i32) {
    %c0_i32 = arith.constant 0 : i32
    %c0_i32_0 = arith.constant 0 : i32
    %c0_i32_1 = arith.constant 0 : i32
    %c0_i32_2 = arith.constant 0 : i32
    return %c0_i32, %c0_i32_0, %c0_i32_1 : i32, i32, i32
  }
  func.func @transform_2(%arg0: i32, %arg1: i32) -> (i32, i32, i32) {
    %c0_i32 = arith.constant 0 : i32
    %c0_i32_0 = arith.constant 0 : i32
    %c0_i32_1 = arith.constant 0 : i32
    %c0_i32_2 = arith.constant 0 : i32
    return %c0_i32, %c0_i32_0, %c0_i32_1 : i32, i32, i32
  }
  func.func @transform_3(%arg0: i32, %arg1: i32) -> (i32, i32, i32) {
    %c0_i32 = arith.constant 0 : i32
    %c0_i32_0 = arith.constant 0 : i32
    %c0_i32_1 = arith.constant 0 : i32
    %c0_i32_2 = arith.constant 0 : i32
    return %c0_i32, %c0_i32_0, %c0_i32_1 : i32, i32, i32
  }
  func.func @transform_4(%arg0: i32, %arg1: i32) -> (i32, i32, i32) {
    %0 = arith.muli %arg0, %arg1 : i32
    %c0_i32 = arith.constant 0 : i32
    %c0_i32_0 = arith.constant 0 : i32
    %c0_i32_1 = arith.constant 0 : i32
    return %0, %c0_i32, %c0_i32_0 : i32, i32, i32
  }
}

</mosaic_0001>

<bundles_post_ra>
// kernel: tpu_custom_call.1
= control target key start
LH: loop header
LB: loop body
LE: loop exit
PB: predicated region body
PF: predicated region fallthrough
CT: control target
= control target key end

     0   :  { %9 = vsyncpa [#allocation6], 0  ;;  %s2398_s0 = inlined_call_operand.vmem [shape: f32[2,4,256], index: 0, kind: input, shape index: {}]   ;;  %s2399_s1 = inlined_call_operand.vmem [shape: f32[9,8,4], index: 1, kind: input, shape index: {}]   ;;  %s2400_s2 = inlined_call_operand.vmem [shape: f32[9,1,256], index: 2, kind: input, shape index: {}]   ;;  %s2401_s3 = inlined_call_operand.vmem [shape: f32[3,8,1], index: 3, kind: input, shape index: {}]   ;;  %s2402_s4 = inlined_call_operand.hbm [shape: f32[2,8,256], index: 4, kind: output, shape index: {}]  }
   0x1   :  { %11 = vsyncpa [#allocation6 + $0x1], 0  ;;  %s2008_s15 = smov 0   ;;  %s2010_s16 = smov 0  }
   0x2   :  { %s2012_s17 = smov 0  }
   0x3 LB: > { %s1734_s18 = sadd.s32 4294967295, %s1967_s17   ;;  %s1735_s19 = sadd.s32 4294967294, %s1967_s17   ;;  %s1967_s17 = sphi %s2012_s17, %s17_s17   ;;  %s1963_s16 = sphi %s2010_s16, %s2404_s16   ;;  %s1959_s15 = sphi %s2008_s15, %s2403_s15  }
   0x4   : > { %s29_s20 = sadd.s32 1, %s1963_s16  ;;  %p1739_p0 = scmp.ge.s32.totalorder %s1967_s17, 1 }
   0x5   : > { %p31_p1 = scmp.ge.s32.totalorder %s29_s20, 2  ;;  %p189_p2 = scmp.lt.s32.totalorder %s1967_s17, 3 }
   0x7   : > { %s2406_s20 = smov (%p31_p1, %s29_s20), 0  ;;  %p190_p3 = pnand %p1739_p0, %p189_p2 }
   0x8   : > { %p231_p4 = scmp.eq.s32.totalorder (!%p190_p3), %s1959_s15, 0 }
   0x9   : > { %193 = sbr.rel (%p190_p3) target bundleno = 742 (0x2e6), region = 36 }
   0xe   : > { %236 = sbr.rel (!%p231_p4) target bundleno = 19 (0x13), region = 40  ;;  %vm237_vm0 = vcmask (%p231_p4), 7168   ;;  %v1969_v0 = vmov (%p231_p4), 0.0  }
   0xf   : > { %238 = vst.msk [vmem:[#allocation2] sm:$0xff] (%p231_p4), %vm237_vm0, %v1969_v0 }
  0x10   : > { %239 = vst.msk [vmem:[#allocation3] sm:$0xff] (%p231_p4), %vm237_vm0, %v1969_v0 }
  0x13 PF: > { %v2034_v1 = vld [vmem:[%s2401_s3] sm:$0xff]  ;;  %p1741_p5 = scmp.ne.s32.totalorder %s1959_s15, 0 }
  0x14   : > { %s1970_s25 = smov (!%p1741_p5), 17   ;;  %s1971_s26 = smov (!%p1741_p5), 16  }
  0x15   : > { %243 = sbr.rel (%p1741_p5) target bundleno = 561 (0x231), region = 44  ;;  %s1972_s27 = smov (!%p1741_p5), 15  }
  0x16   : > { %s1973_s28 = smov (!%p1741_p5), 1   ;;  %s1974_s29 = smov (!%p1741_p5), 127  }
  0x17   : > { %s1975_s30 = smov (!%p1741_p5), 113   ;;  %s1976_s5 = smov (!%p1741_p5), 112  }
  0x18   : > { %s1977_s8 = smov (!%p1741_p5), 111  }
  0x1a   : > { %v244_v2 = vld [vmem:[%s2398_s0] sm:$0xff]  ;;  %v2061_v19 = vld [vmem:[%s2398_s0 + $0x8] sm:$0xff]  ;;  %v257_v35 = vlaneseq  ;;  %vm275_vm1 = vcmask 1043456   ;;  %vm271_vm3 = vcmask 31744   ;;  %vm1553_vm11 = vcmask 7168  }
  0x1b   : > { %248 = vst [vmem:[#allocation1] ss:$2 sm:$0xff] %v244_v2  ;;  %v262_v38 = vld [vmem:[%s2400_s2] sm:$0x3]  ;;  %v1751_v39 = vld [vmem:[%s2400_s2 + $0x2] sm:$0x3] }
  0x1c   : > { %v2085_v37 = vand.u32 127, %v257_v35  ;;  %v387_v40 = vperm.slane %v1751_v39, 0  ;;  %v388_v41 = vperm.slane %v1751_v39, 1  ;;  %v2101_v42 = vld [vmem:[%s2399_s1 + $0x20] sm:$0xff]  ;;  %v264_v45 = vperm.slane %v262_v38, 0  ;;  %v2137_v60 = vld [vmem:[%s2399_s1 + $0x8] sm:$0xff] }
  0x1d   : > { %v265_v46 = vperm.slane %v262_v38, 1  ;;  %v2122_v57 = vld [vmem:[%s2399_s1] sm:$0xff] }
  0x1e   : > { %vm381_vm2 = vcmp.lt.s32.totalorder %v2085_v37, 16  ;;  %vm259_vm4 = vcmp.lt.s32.totalorder %v2085_v37, 17  ;;  %v1757_v0 = vld [vmem:[%s2400_s2 + $0x4] sm:$0x3]  ;;  %vm455_vm5 = vcmp.lt.s32.totalorder %v2085_v37, 15  ;;  %vm529_vm6 = vcmp.lt.s32.totalorder %v2085_v37, 1 }
  0x1f   : > { %vm603_vm7 = vcmp.lt.s32.totalorder %v2085_v37, 127  ;;  %vm677_vm8 = vcmp.lt.s32.totalorder %v2085_v37, 113  ;;  %vm751_vm9 = vcmp.lt.s32.totalorder %v2085_v37, 112  ;;  %vm825_vm10 = vcmp.lt.s32.totalorder %v2085_v37, 111 }
  0x22   : > { %v249_v3 = vld.sshfl [vmem:[#allocation1] sm:$0xff pattern:$0x75316420]  ;;  %v250_v4 = vld.sshfl [vmem:[#allocation1 + $0x8] sm:$0xff pattern:$0x75316420] }
  0x23   : > { %253 = vrot.lane.b32.xlu0 %v249_v3, %s1970_s25  ;;  %322 = vst [vmem:[#allocation1] ss:$2 sm:$0xff] %v244_v2  ;;  %v461_v3 = vperm.slane %v1757_v0, 0 }
  0x2a   : > { %v2041_v5 = vld.sshfl [vmem:[#allocation1] sm:$0xff pattern:$0x75316420]  ;;  %v2043_v6 = vld.sshfl [vmem:[#allocation1 + $0x8] sm:$0xff pattern:$0x75316420] }
  0x2b   : > { %372 = vst [vmem:[#allocation1] ss:$2 sm:$0xff] %v244_v2  ;;  %255 = vrot.lane.b32.xlu0 %v250_v4, %s1970_s25  ;;  %1747 = vmatpush.msk.msra.mxu2 %vm275_vm1, %v2041_v5  ;;  %v462_v4 = vperm.slane %v1757_v0, 1 }
  0x2c   : > { %1749 = vmatpush.msk.msra.mxu3 %vm275_vm1, %v2043_v6  ;;  %1748 = vmatmul.msk.f32.vlgmr.msra.gmra.mxu2 %vm271_vm3, %v2101_v42 }
  0x2d   : > { %1750 = vmatmul.msk.f32.vlgmr.msra.gmra.mxu3 %vm271_vm3, %v2101_v42 }
  0x32   : > { %v373_v7 = vld.sshfl [vmem:[#allocation1] sm:$0xff pattern:$0x75316420]  ;;  %v374_v8 = vld.sshfl [vmem:[#allocation1 + $0x8] sm:$0xff pattern:$0x75316420] }
  0x33   : > { %446 = vst [vmem:[#allocation1] ss:$2 sm:$0xff] %v244_v2  ;;  %377 = vrot.lane.b32.xlu2 %v373_v7, %s1971_s26 }
  0x3a   : > { %v447_v9 = vld.sshfl [vmem:[#allocation1] sm:$0xff pattern:$0x75316420]  ;;  %v448_v10 = vld.sshfl [vmem:[#allocation1 + $0x8] sm:$0xff pattern:$0x75316420] }
  0x3b   : > { %451 = vrot.lane.b32.xlu1 %v447_v9, %s1972_s27  ;;  %520 = vst [vmem:[#allocation1] ss:$2 sm:$0xff] %v244_v2  ;;  %379 = vrot.lane.b32.xlu2 %v374_v8, %s1971_s26 }
  0x42   : > { %v522_v11 = vld.sshfl [vmem:[#allocation1 + $0x8] sm:$0xff pattern:$0x75316420]  ;;  %v521_v12 = vld.sshfl [vmem:[#allocation1] sm:$0xff pattern:$0x75316420] }
  0x43   : > { %453 = vrot.lane.b32.xlu1 %v448_v10, %s1972_s27  ;;  %527 = vrot.lane.b32.xlu0 %v522_v11, %s1973_s28  ;;  %594 = vst [vmem:[#allocation1] ss:$2 sm:$0xff] %v244_v2 }
  0x44   : > { %525 = vrot.lane.b32.xlu2 %v521_v12, %s1973_s28 }
  0x4a   : > { %v596_v13 = vld.sshfl [vmem:[#allocation1 + $0x8] sm:$0xff pattern:$0x75316420]  ;;  %v595_v14 = vld.sshfl [vmem:[#allocation1] sm:$0xff pattern:$0x75316420] }
  0x4b   : > { %601 = vrot.lane.b32.xlu1 %v596_v13, %s1974_s29  ;;  %599 = vrot.lane.b32.xlu0 %v595_v14, %s1974_s29  ;;  %668 = vst [vmem:[#allocation1] ss:$2 sm:$0xff] %v244_v2 }
  0x52   : > { %v670_v15 = vld.sshfl [vmem:[#allocation1 + $0x8] sm:$0xff pattern:$0x75316420]  ;;  %v669_v16 = vld.sshfl [vmem:[#allocation1] sm:$0xff pattern:$0x75316420] }
  0x53   : > { %675 = vrot.lane.b32.xlu1 %v670_v15, %s1975_s30  ;;  %673 = vrot.lane.b32.xlu0 %v669_v16, %s1975_s30  ;;  %742 = vst [vmem:[#allocation1] ss:$2 sm:$0xff] %v244_v2 }
  0x5a   : > { %v743_v17 = vld.sshfl [vmem:[#allocation1] sm:$0xff pattern:$0x75316420]  ;;  %v744_v18 = vld.sshfl [vmem:[#allocation1 + $0x8] sm:$0xff pattern:$0x75316420] }
  0x5b   : > { %747 = vrot.lane.b32.xlu1 %v743_v17, %s1976_s5  ;;  %816 = vst [vmem:[#allocation1] ss:$2 sm:$0xff] %v244_v2  ;;  %749 = vrot.lane.b32.xlu2 %v744_v18, %s1976_s5  ;;  %v1763_v2 = vld [vmem:[%s2400_s2 + $0x6] sm:$0x3]  ;;  %v2166_v18 = vld [vmem:[%s2399_s1 + $0x10] sm:$0xff] }
  0x5c   : > { %v535_v5 = vperm.slane %v1763_v2, 0  ;;  %v536_v6 = vperm.slane %v1763_v2, 1  ;;  %v2253_v2 = vld [vmem:[%s2399_s1 + $0x40] sm:$0xff] }
  0x62   : > { %v817_v20 = vld.sshfl [vmem:[#allocation1] sm:$0xff pattern:$0x75316420]  ;;  %v818_v21 = vld.sshfl [vmem:[#allocation1 + $0x8] sm:$0xff pattern:$0x75316420] }
  0x63   : > { %917 = vst [vmem:[#allocation1] ss:$2 sm:$0xff] %v2061_v19  ;;  %821 = vrot.lane.b32.xlu1 %v817_v20, %s1977_s8  ;;  %823 = vrot.lane.b32.xlu2 %v818_v21, %s1977_s8  ;;  %v2176_v20 = vld [vmem:[%s2399_s1 + $0x18] sm:$0xff] }
  0x6a   : > { %v919_v22 = vld.sshfl [vmem:[#allocation1 + $0x8] sm:$0xff pattern:$0x75316420]  ;;  %v918_v23 = vld.sshfl [vmem:[#allocation1] sm:$0xff pattern:$0x75316420] }
  0x6b   : > { %924 = vrot.lane.b32.xlu0 %v919_v22, %s1970_s25  ;;  %986 = vst [vmem:[#allocation1] ss:$2 sm:$0xff] %v2061_v19  ;;  %922 = vrot.lane.b32.xlu2 %v918_v23, %s1970_s25 }
  0x72   : > { %v2069_v24 = vld.sshfl [vmem:[#allocation1] sm:$0xff pattern:$0x75316420]  ;;  %v2071_v25 = vld.sshfl [vmem:[#allocation1 + $0x8] sm:$0xff pattern:$0x75316420] }
  0x73   : > { %1036 = vst [vmem:[#allocation1] ss:$2 sm:$0xff] %v2061_v19 }
  0x7a   : > { %v1037_v26 = vld.sshfl [vmem:[#allocation1] sm:$0xff pattern:$0x75316420]  ;;  %v1038_v27 = vld.sshfl [vmem:[#allocation1 + $0x8] sm:$0xff pattern:$0x75316420] }
  0x7b   : > { %1041 = vrot.lane.b32.xlu0 %v1037_v26, %s1971_s26  ;;  %1043 = vrot.lane.b32.xlu1 %v1038_v27, %s1971_s26  ;;  %1107 = vst [vmem:[#allocation1] ss:$2 sm:$0xff] %v2061_v19 }
  0x82   : > { %v1108_v28 = vld.sshfl [vmem:[#allocation1] sm:$0xff pattern:$0x75316420]  ;;  %v1109_v29 = vld.sshfl [vmem:[#allocation1 + $0x8] sm:$0xff pattern:$0x75316420] }
  0x83   : > { %1178 = vst [vmem:[#allocation1] ss:$2 sm:$0xff] %v2061_v19  ;;  %1112 = vrot.lane.b32.xlu1 %v1108_v28, %s1972_s27  ;;  %1114 = vrot.lane.b32.xlu2 %v1109_v29, %s1972_s27 }
  0x8a   : > { %v1180_v30 = vld.sshfl [vmem:[#allocation1 + $0x8] sm:$0xff pattern:$0x75316420]  ;;  %v1179_v31 = vld.sshfl [vmem:[#allocation1] sm:$0xff pattern:$0x75316420] }
  0x8b   : > { %1185 = vrot.lane.b32.xlu0 %v1180_v30, %s1973_s28  ;;  %1249 = vst [vmem:[#allocation1] ss:$2 sm:$0xff] %v2061_v19  ;;  %1183 = vrot.lane.b32.xlu2 %v1179_v31, %s1973_s28  ;;  %v2196_v31 = vld [vmem:[%s2399_s1 + $0x28] sm:$0xff] }
  0x8d   : > { %v378_v34 = vpop.permute.xlu2 %377 }
  0x92   : > { %v1250_v32 = vld.sshfl [vmem:[#allocation1] sm:$0xff pattern:$0x75316420]  ;;  %v1251_v33 = vld.sshfl [vmem:[#allocation1 + $0x8] sm:$0xff pattern:$0x75316420] }
  0x93   : > { %1320 = vst [vmem:[#allocation1] ss:$2 sm:$0xff] %v2061_v19  ;;  %1254 = vrot.lane.b32.xlu2 %v1250_v32, %s1974_s29  ;;  %v1775_v32 = vld [vmem:[%s2400_s2 + $0xc] sm:$0x3] }
  0x95   : > { %v254_v36 = vpop.permute.xlu0 %253  ;;  %v380_v47 = vpop.permute.xlu2 %379 }
  0x96   : > { %v382_v48 = vsel %vm381_vm2, %v378_v34, %v380_v47  ;;  %v383_v49 = vsel %vm381_vm2, %v380_v47, %v378_v34  ;;  %v684_v34 = vperm.slane %v1775_v32, 1 }
  0x97   : > { %v391_v53 = vmul.f32 %v387_v40, %v383_v49  ;;  %v392_v54 = vmul.f32 %v388_v41, %v382_v48 }
  0x9a   : > { %v1321_v43 = vld.sshfl [vmem:[#allocation1] sm:$0xff pattern:$0x75316420]  ;;  %v1322_v44 = vld.sshfl [vmem:[#allocation1 + $0x8] sm:$0xff pattern:$0x75316420] }
  0x9b   : > { %1325 = vrot.lane.b32.xlu0 %v1321_v43, %s1975_s30  ;;  %1327 = vrot.lane.b32.xlu1 %v1322_v44, %s1975_s30  ;;  %1391 = vst [vmem:[#allocation1] ss:$2 sm:$0xff] %v2061_v19  ;;  %v2215_v44 = vld [vmem:[%s2399_s1 + $0x30] sm:$0xff] }
  0x9d   : > { %v256_v50 = vpop.permute.xlu0 %255 }
  0x9e   : > { %v260_v51 = vsel %vm259_vm4, %v254_v36, %v256_v50  ;;  %v261_v52 = vsel %vm259_vm4, %v256_v50, %v254_v36  ;;  %v526_v7 = vpop.permute.xlu2 %525 }
  0x9f   : > { %v268_v55 = vmul.f32 %v264_v45, %v261_v52  ;;  %v269_v56 = vmul.f32 %v265_v46, %v260_v51  ;;  %v1781_v45 = vld [vmem:[%s2400_s2 + $0xe] sm:$0x3] }
  0xa0   : > { %v757_v46 = vperm.slane %v1781_v45, 0  ;;  %v758_v47 = vperm.slane %v1781_v45, 1 }
  0xa1   : > { %1743 = vmatpush.msk.msra.mxu0 %vm275_vm1, %v268_v55  ;;  %1745 = vmatpush.msk.msra.mxu1 %vm275_vm1, %v269_v56 }
  0xa2   : > { %v1392_v58 = vld.sshfl [vmem:[#allocation1] sm:$0xff pattern:$0x75316420]  ;;  %v1393_v59 = vld.sshfl [vmem:[#allocation1 + $0x8] sm:$0xff pattern:$0x75316420]  ;;  %1744 = vmatmul.msk.f32.vlgmr.msra.gmra.mxu0 %vm271_vm3, %v2122_v57  ;;  %1746 = vmatmul.msk.f32.vlgmr.msra.gmra.mxu1 %vm271_vm3, %v2122_v57 }
  0xa3   : > { %1753 = vmatpush.msk.msrb.mxu0 %vm275_vm1, %v391_v53  ;;  %1755 = vmatpush.msk.msrb.mxu1 %vm275_vm1, %v392_v54  ;;  %1462 = vst [vmem:[#allocation1] ss:$2 sm:$0xff] %v2061_v19  ;;  %v1769_v19 = vld [vmem:[%s2400_s2 + $0xa] sm:$0x3]  ;;  %v2234_v53 = vld [vmem:[%s2399_s1 + $0x38] sm:$0xff] }
  0xa4   : > { %1256 = vrot.lane.b32.xlu0 %v1251_v33, %s1974_s29  ;;  %v609_v21 = vperm.slane %v1769_v19, 0  ;;  %v610_v22 = vperm.slane %v1769_v19, 1  ;;  %v683_v33 = vperm.slane %v1775_v32, 0  ;;  %v1787_v54 = vld [vmem:[%s2400_s2 + $0x10] sm:$0x3] }
  0xa5   : > { %v831_v56 = vperm.slane %v1787_v54, 0 }
  0xaa   : > { %v1463_v61 = vld.sshfl [vmem:[#allocation1] sm:$0xff pattern:$0x75316420]  ;;  %v1464_v62 = vld.sshfl [vmem:[#allocation1 + $0x8] sm:$0xff pattern:$0x75316420]  ;;  %1754 = vmatmul.msk.f32.vlgmr.msrb.gmra.mxu0 %vm271_vm3, %v2137_v60  ;;  %1756 = vmatmul.msk.f32.vlgmr.msrb.gmra.mxu1 %vm271_vm3, %v2137_v60 }
  0xab   : > { %1467 = vrot.lane.b32.xlu1 %v1463_v61, %s1977_s8  ;;  %1469 = vrot.lane.b32.xlu2 %v1464_v62, %s1977_s8 }
  0xac   : > { %1396 = vrot.lane.b32.xlu0 %v1392_v58, %s1976_s5  ;;  %v832_v58 = vperm.slane %v1787_v54, 1 }
  0xad   : > { %v452_v63 = vpop.permute.xlu1 %451 }
  0xb3   : > { %1398 = vrot.lane.b32.xlu1 %v1393_v59, %s1976_s5 }
  0xb5   : > { %v454_v8 = vpop.permute.xlu1 %453  ;;  %v528_v9 = vpop.permute.xlu0 %527 }
  0xb6   : > { %v456_v10 = vsel %vm455_vm5, %v452_v63, %v454_v8  ;;  %v457_v11 = vsel %vm455_vm5, %v454_v8, %v452_v63  ;;  %v530_v12 = vsel %vm529_vm6, %v526_v7, %v528_v9  ;;  %v531_v13 = vsel %vm529_vm6, %v528_v9, %v526_v7  ;;  %v750_v40 = vpop.permute.xlu2 %749 }
  0xb7   : > { %v465_v14 = vmul.f32 %v461_v3, %v457_v11  ;;  %v466_v15 = vmul.f32 %v462_v4, %v456_v10  ;;  %v539_v16 = vmul.f32 %v535_v5, %v531_v13  ;;  %v540_v17 = vmul.f32 %v536_v6, %v530_v12  ;;  %v928_v3 = vld [vmem:[%s2400_s2] sm:$0x3] }
  0xb8   : > { %v930_v4 = vperm.slane %v928_v3, 0  ;;  %v931_v5 = vperm.slane %v928_v3, 1 }
  0xb9   : > { %1759 = vmatpush.msk.msrb.mxu2 %vm275_vm1, %v465_v14  ;;  %1761 = vmatpush.msk.msrb.mxu3 %vm275_vm1, %v466_v15 }
  0xba   : > { %1760 = vmatmul.msk.f32.vlgmr.msrb.gmra.mxu2 %vm271_vm3, %v2166_v18  ;;  %1762 = vmatmul.msk.f32.vlgmr.msrb.gmra.mxu3 %vm271_vm3, %v2166_v18 }
  0xbb   : > { %1765 = vmatpush.msk.msra.mxu0 %vm275_vm1, %v539_v16  ;;  %1767 = vmatpush.msk.msra.mxu1 %vm275_vm1, %v540_v17 }
  0xbc   : > { %1766 = vmatmul.msk.f32.vlgmr.msra.gmra.mxu0 %vm271_vm3, %v2176_v20  ;;  %1768 = vmatmul.msk.f32.vlgmr.msra.gmra.mxu1 %vm271_vm3, %v2176_v20 }
  0xbd   : > { %v602_v23 = vpop.permute.xlu1 %601  ;;  %v600_v26 = vpop.permute.xlu0 %599 }
  0xbe   : > { %v604_v27 = vsel %vm603_vm7, %v600_v26, %v602_v23  ;;  %v605_v28 = vsel %vm603_vm7, %v602_v23, %v600_v26  ;;  %v824_v55 = vpop.permute.xlu2 %823 }
  0xbf   : > { %v613_v29 = vmul.f32 %v609_v21, %v604_v27  ;;  %v614_v30 = vmul.f32 %v610_v22, %v605_v28 }
  0xc1   : > { %1773 = vmatpush.msk.msra.mxu3 %vm275_vm1, %v614_v30  ;;  %1771 = vmatpush.msk.msra.mxu2 %vm275_vm1, %v613_v29  ;;  %v1815_v30 = vld [vmem:[%s2400_s2 + $0x6] sm:$0x3] }
  0xc2   : > { %1772 = vmatmul.msk.f32.vlgmr.msra.gmra.mxu2 %vm271_vm3, %v2196_v31  ;;  %1774 = vmatmul.msk.f32.vlgmr.msra.gmra.mxu3 %vm271_vm3, %v2196_v31  ;;  %v1192_v32 = vperm.slane %v1815_v30, 1 }
  0xc5   : > { %v676_v35 = vpop.permute.xlu1 %675  ;;  %v674_v36 = vpop.permute.xlu0 %673 }
  0xc6   : > { %v678_v38 = vsel %vm677_vm8, %v674_v36, %v676_v35  ;;  %v679_v39 = vsel %vm677_vm8, %v676_v35, %v674_v36  ;;  %v923_v6 = vpop.permute.xlu2 %922 }
  0xc7   : > { %v687_v41 = vmul.f32 %v683_v33, %v678_v38  ;;  %v688_v43 = vmul.f32 %v684_v34, %v679_v39  ;;  %v1978_v34 = vmov 0  }
  0xc8   : > { %1908 = vset.pattern.permute.xlu2 %v1978_v34  ;;  %1909 = vset.pattern.permute.xlu0 %v1978_v34 }
  0xc9   : > { %1777 = vmatpush.msk.msrb.mxu0 %vm275_vm1, %v687_v41  ;;  %1779 = vmatpush.msk.msrb.mxu1 %vm275_vm1, %v688_v43 }
  0xca   : > { %1778 = vmatmul.msk.f32.vlgmr.msrb.gmra.mxu0 %vm271_vm3, %v2215_v44  ;;  %1780 = vmatmul.msk.f32.vlgmr.msrb.gmra.mxu1 %vm271_vm3, %v2215_v44 }
  0xcb   : > { %892 = vperm.xlu2 %1908, %v2034_v1   ;;  %v1827_v1 = vld [vmem:[%s2400_s2 + $0xc] sm:$0x3] }
  0xcc   : > { %v1334_v41 = vperm.slane %v1827_v1, 1 }
  0xcd   : > { %v748_v48 = vpop.permute.xlu1 %747 }
  0xce   : > { %v752_v49 = vsel %vm751_vm9, %v748_v48, %v750_v40  ;;  %v753_v50 = vsel %vm751_vm9, %v750_v40, %v748_v48 }
  0xcf   : > { %v761_v51 = vmul.f32 %v757_v46, %v752_v49  ;;  %v762_v52 = vmul.f32 %v758_v47, %v753_v50 }
  0xd1   : > { %1783 = vmatpush.msk.msrb.mxu2 %vm275_vm1, %v761_v51  ;;  %1785 = vmatpush.msk.msrb.mxu3 %vm275_vm1, %v762_v52 }
  0xd2   : > { %1784 = vmatmul.msk.f32.vlgmr.msrb.gmra.mxu2 %vm271_vm3, %v2234_v53  ;;  %1786 = vmatmul.msk.f32.vlgmr.msrb.gmra.mxu3 %vm271_vm3, %v2234_v53 }
  0xd5   : > { %v822_v59 = vpop.permute.xlu1 %821 }
  0xd6   : > { %v826_v61 = vsel %vm825_vm10, %v822_v59, %v824_v55  ;;  %v827_v62 = vsel %vm825_vm10, %v824_v55, %v822_v59 }
  0xd7   : > { %v835_v63 = vmul.f32 %v831_v56, %v826_v61  ;;  %v836_v0 = vmul.f32 %v832_v58, %v827_v62  ;;  %v1839_v61 = vld [vmem:[%s2400_s2 + $0x10] sm:$0x3] }
  0xd8   : > { %v1475_v62 = vperm.slane %v1839_v61, 0 }
  0xd9   : > { %1789 = vmatpush.msk.msra.mxu0 %vm275_vm1, %v835_v63  ;;  %1791 = vmatpush.msk.msra.mxu1 %vm275_vm1, %v836_v0  ;;  %v1476_v63 = vperm.slane %v1839_v61, 1 }
  0xda   : > { %1790 = vmatmul.msk.f32.vlgmr.msra.gmra.mxu0 %vm271_vm3, %v2253_v2  ;;  %1792 = vmatmul.msk.f32.vlgmr.msra.gmra.mxu1 %vm271_vm3, %v2253_v2 }
  0xdb   : > { %1801 = vmatpush.msk.msrb.mxu1 %vm275_vm1, %v2071_v25  ;;  %1799 = vmatpush.msk.msrb.mxu0 %vm275_vm1, %v2069_v24  ;;  %v1803_v24 = vld [vmem:[%s2400_s2 + $0x2] sm:$0x3] }
  0xdc   : > { %v1049_v25 = vperm.slane %v1803_v24, 0  ;;  %v1050_v12 = vperm.slane %v1803_v24, 1 }
  0xdd   : > { %v925_v7 = vpop.permute.xlu0 %924  ;;  %v1115_v19 = vpop.permute.xlu2 %1114 }
  0xde   : > { %v926_v8 = vsel %vm259_vm4, %v923_v6, %v925_v7  ;;  %v927_v9 = vsel %vm259_vm4, %v925_v7, %v923_v6  ;;  %v1833_v7 = vld [vmem:[%s2400_s2 + $0xe] sm:$0x3] }
  0xdf   : > { %v934_v10 = vmul.f32 %v930_v4, %v927_v9  ;;  %v935_v11 = vmul.f32 %v931_v5, %v926_v8  ;;  %v1404_v8 = vperm.slane %v1833_v7, 0  ;;  %v1405_v9 = vperm.slane %v1833_v7, 1 }
  0xe1   : > { %1797 = vmatpush.msk.msra.mxu3 %vm275_vm1, %v935_v11  ;;  %1795 = vmatpush.msk.msra.mxu2 %vm275_vm1, %v934_v10 }
  0xe2   : > { %1796 = vmatmul.msk.f32.vlgmr.msra.gmra.mxu2 %vm271_vm3, %v2122_v57  ;;  %1798 = vmatmul.msk.f32.vlgmr.msra.gmra.mxu3 %vm271_vm3, %v2122_v57 }
  0xe3   : > { %1800 = vmatmul.msk.f32.vlgmr.msrb.gmra.mxu0 %vm271_vm3, %v2101_v42  ;;  %1802 = vmatmul.msk.f32.vlgmr.msrb.gmra.mxu1 %vm271_vm3, %v2101_v42  ;;  %v1809_v42 = vld [vmem:[%s2400_s2 + $0x4] sm:$0x3] }
  0xe4   : > { %v1120_v21 = vperm.slane %v1809_v42, 0  ;;  %v1121_v22 = vperm.slane %v1809_v42, 1 }
  0xe5   : > { %v1184_v33 = vpop.permute.xlu2 %1183 }
  0xed   : > { %v1042_v13 = vpop.permute.xlu0 %1041  ;;  %v1044_v14 = vpop.permute.xlu1 %1043 }
  0xee   : > { %v1045_v15 = vsel %vm381_vm2, %v1042_v13, %v1044_v14  ;;  %v1046_v57 = vsel %vm381_vm2, %v1044_v14, %v1042_v13  ;;  %v1255_v50 = vpop.permute.xlu2 %1254  ;;  %v349_v14 = vpop.f32.mrf.mxu2 }
  0xef   : > { %v1053_v16 = vmul.f32 %v1049_v25, %v1046_v57  ;;  %v1054_v17 = vmul.f32 %v1050_v12, %v1045_v15  ;;  %v369_v15 = vpop.f32.mrf.mxu3 }
  0xf1   : > { %1807 = vmatpush.msk.msrb.mxu3 %vm275_vm1, %v1054_v17  ;;  %1805 = vmatpush.msk.msrb.mxu2 %vm275_vm1, %v1053_v16 }
  0xf2   : > { %1806 = vmatmul.msk.f32.vlgmr.msrb.gmra.mxu2 %vm271_vm3, %v2137_v60  ;;  %1808 = vmatmul.msk.f32.vlgmr.msrb.gmra.mxu3 %vm271_vm3, %v2137_v60  ;;  %v1191_v60 = vperm.slane %v1815_v30, 0 }
  0xf5   : > { %v1113_v23 = vpop.permute.xlu1 %1112 }
  0xf6   : > { %v1116_v26 = vsel %vm455_vm5, %v1113_v23, %v1115_v19  ;;  %v1117_v27 = vsel %vm455_vm5, %v1115_v19, %v1113_v23 }
  0xf7   : > { %v1124_v28 = vmul.f32 %v1120_v21, %v1117_v27  ;;  %v1125_v29 = vmul.f32 %v1121_v22, %v1116_v26 }
  0xf9   : > { %1811 = vmatpush.msk.msra.mxu0 %vm275_vm1, %v1124_v28  ;;  %1813 = vmatpush.msk.msra.mxu1 %vm275_vm1, %v1125_v29 }
  0xfa   : > { %1812 = vmatmul.msk.f32.vlgmr.msra.gmra.mxu0 %vm271_vm3, %v2166_v18  ;;  %1814 = vmatmul.msk.f32.vlgmr.msra.gmra.mxu1 %vm271_vm3, %v2166_v18  ;;  %v1333_v18 = vperm.slane %v1827_v1, 0 }
  0xfd   : > { %v1186_v35 = vpop.permute.xlu0 %1185 }
  0xfe   : > { %v1187_v36 = vsel %vm529_vm6, %v1184_v33, %v1186_v35  ;;  %v1188_v38 = vsel %vm529_vm6, %v1186_v35, %v1184_v33 }
  0xff   : > { %v1195_v39 = vmul.f32 %v1191_v60, %v1188_v38  ;;  %v1196_v40 = vmul.f32 %v1192_v32, %v1187_v36 }
 0x101   : > { %1819 = vmatpush.msk.msra.mxu3 %vm275_vm1, %v1196_v40  ;;  %1817 = vmatpush.msk.msra.mxu2 %vm275_vm1, %v1195_v39 }
 0x102   : > { %1818 = vmatmul.msk.f32.vlgmr.msra.gmra.mxu2 %vm271_vm3, %v2176_v20  ;;  %1820 = vmatmul.msk.f32.vlgmr.msra.gmra.mxu3 %vm271_vm3, %v2176_v20  ;;  %v1821_v20 = vld [vmem:[%s2400_s2 + $0xa] sm:$0x3] }
 0x103   : > { %v1262_v51 = vperm.slane %v1821_v20, 0  ;;  %v1263_v52 = vperm.slane %v1821_v20, 1 }
 0x10d   : > { %v1326_v43 = vpop.permute.xlu0 %1325  ;;  %v1328_v45 = vpop.permute.xlu1 %1327 }
 0x10e   : > { %v1329_v46 = vsel %vm677_vm8, %v1326_v43, %v1328_v45  ;;  %v1330_v47 = vsel %vm677_vm8, %v1328_v45, %v1326_v43 }
 0x10f   : > { %v1337_v48 = vmul.f32 %v1333_v18, %v1329_v46  ;;  %v1338_v49 = vmul.f32 %v1334_v41, %v1330_v47 }
 0x111   : > { %1831 = vmatpush.msk.msrb.mxu3 %vm275_vm1, %v1338_v49  ;;  %1829 = vmatpush.msk.msrb.mxu2 %vm275_vm1, %v1337_v48 }
 0x112   : > { %1830 = vmatmul.msk.f32.vlgmr.msrb.gmra.mxu2 %vm271_vm3, %v2215_v44  ;;  %1832 = vmatmul.msk.f32.vlgmr.msrb.gmra.mxu3 %vm271_vm3, %v2215_v44  ;;  %v1470_v44 = vpop.permute.xlu2 %1469 }
 0x116   : > { %v1257_v54 = vpop.permute.xlu0 %1256 }
 0x117   : > { %v1258_v55 = vsel %vm603_vm7, %v1255_v50, %v1257_v54  ;;  %v1259_v56 = vsel %vm603_vm7, %v1257_v54, %v1255_v50 }
 0x118   : > { %v1266_v58 = vmul.f32 %v1262_v51, %v1258_v55  ;;  %v1267_v59 = vmul.f32 %v1263_v52, %v1259_v56 }
 0x11a   : > { %1823 = vmatpush.msk.msrb.mxu0 %vm275_vm1, %v1266_v58  ;;  %1825 = vmatpush.msk.msrb.mxu1 %vm275_vm1, %v1267_v59 }
 0x11b   : > { %1824 = vmatmul.msk.f32.vlgmr.msrb.gmra.mxu0 %vm271_vm3, %v2196_v31  ;;  %1826 = vmatmul.msk.f32.vlgmr.msrb.gmra.mxu1 %vm271_vm3, %v2196_v31 }
 0x11d   : > { %v1468_v0 = vpop.permute.xlu1 %1467 }
 0x11e   : > { %v1471_v3 = vsel %vm825_vm10, %v1468_v0, %v1470_v44  ;;  %v1472_v4 = vsel %vm825_vm10, %v1470_v44, %v1468_v0  ;;  %v1397_v31 = vpop.permute.xlu0 %1396 }
 0x11f   : > { %v1479_v5 = vmul.f32 %v1475_v62, %v1471_v3  ;;  %v1480_v6 = vmul.f32 %v1476_v63, %v1472_v4  ;;  %v319_v13 = vpop.f32.mrf.mxu1 }
 0x120   : > { %v370_v17 = vadd.f32 %v369_v15, %v319_v13 }
 0x121   : > { %1841 = vmatpush.msk.msra.mxu2 %vm275_vm1, %v1479_v5  ;;  %1843 = vmatpush.msk.msra.mxu3 %vm275_vm1, %v1480_v6 }
 0x122   : > { %1842 = vmatmul.msk.f32.vlgmr.msra.gmra.mxu2 %vm271_vm3, %v2253_v2  ;;  %1844 = vmatmul.msk.f32.vlgmr.msra.gmra.mxu3 %vm271_vm3, %v2253_v2  ;;  %v299_v2 = vpop.f32.mrf.mxu0 }
 0x123   : > { %v350_v37 = vadd.f32 %v349_v14, %v299_v2 }
 0x125   : > { %v1399_v10 = vpop.permute.xlu1 %1398  ;;  %v893_v47 = vpop.permute.xlu2 %892 }
 0x126   : > { %v1400_v11 = vsel %vm751_vm9, %v1397_v31, %v1399_v10  ;;  %v1401_v24 = vsel %vm751_vm9, %v1399_v10, %v1397_v31 }
 0x127   : > { %v1408_v25 = vmul.f32 %v1404_v8, %v1400_v11  ;;  %v1409_v12 = vmul.f32 %v1405_v9, %v1401_v24  ;;  %v441_v16 = vpop.f32.mrf.mxu1 }
 0x128   : > { %v445_v22 = vadd.f32 %v441_v16, %v370_v17 }
 0x129   : > { %1835 = vmatpush.msk.msra.mxu0 %vm275_vm1, %v1408_v25  ;;  %1837 = vmatpush.msk.msra.mxu1 %vm275_vm1, %v1409_v12 }
 0x12a   : > { %1836 = vmatmul.msk.f32.vlgmr.msra.gmra.mxu0 %vm271_vm3, %v2234_v53  ;;  %1838 = vmatmul.msk.f32.vlgmr.msra.gmra.mxu1 %vm271_vm3, %v2234_v53  ;;  %v421_v57 = vpop.f32.mrf.mxu0 }
 0x12b   : > { %v444_v21 = vadd.f32 %v421_v57, %v350_v37 }
 0x139   : > { %v569_v23 = vpop.f32.mrf.mxu0  ;;  %v589_v26 = vpop.f32.mrf.mxu1 }
 0x13d   : > { %v495_v42 = vpop.f32.mrf.mxu2  ;;  %v515_v19 = vpop.f32.mrf.mxu3 }
 0x13e   : > { %v518_v27 = vadd.f32 %v495_v42, %v444_v21  ;;  %v519_v28 = vadd.f32 %v515_v19, %v445_v22 }
 0x140   : > { %v592_v29 = vadd.f32 %v569_v23, %v518_v27  ;;  %v593_v30 = vadd.f32 %v589_v26, %v519_v28 }
 0x145   : > { %v643_v60 = vpop.f32.mrf.mxu2  ;;  %v663_v53 = vpop.f32.mrf.mxu3 }
 0x146   : > { %v666_v34 = vadd.f32 %v643_v60, %v592_v29  ;;  %v667_v35 = vadd.f32 %v663_v53, %v593_v30  ;;  %v1551_v60 = vld [vmem:[#allocation2] sm:$0xff] }
 0x147   : > { %v717_v32 = vpop.f32.mrf.mxu0  ;;  %v737_v33 = vpop.f32.mrf.mxu1 }
 0x148   : > { %v740_v36 = vadd.f32 %v717_v32, %v666_v34  ;;  %v741_v38 = vadd.f32 %v737_v33, %v667_v35  ;;  %v1555_v35 = vld [vmem:[#allocation3] sm:$0xff] }
 0x155   : > { %v791_v39 = vpop.f32.mrf.mxu2  ;;  %v811_v40 = vpop.f32.mrf.mxu3 }
 0x156   : > { %v814_v1 = vadd.f32 %v791_v39, %v740_v36  ;;  %v815_v18 = vadd.f32 %v811_v40, %v741_v38 }
 0x157   : > { %v865_v41 = vpop.f32.mrf.mxu0  ;;  %v885_v43 = vpop.f32.mrf.mxu1 }
 0x158   : > { %v888_v45 = vadd.f32 %v865_v41, %v814_v1  ;;  %v889_v46 = vadd.f32 %v885_v43, %v815_v18 }
 0x15a   : > { %v895_v48 = vadd.f32 %v893_v47, %v888_v45  ;;  %v896_v49 = vadd.f32 %v893_v47, %v889_v46 }
 0x15c   : > { %901 = vst [vmem:[#allocation4 + $0x10] sm:$0xff] %v895_v48  ;;  %v903_v20 = vadd.f32 %v896_v49, %v895_v48  ;;  %v907_v50 = vmul.f32 %v895_v48, %v895_v48  ;;  %v908_v51 = vmul.f32 %v896_v49, %v896_v49 }
 0x15d   : > { %902 = vst [vmem:[#allocation4] sm:$0xff] %v896_v49 }
 0x15e   : > { %904 = vadd.xlane.f32.xlu0 %v903_v20  ;;  %v909_v52 = vadd.f32 %v908_v51, %v907_v50 }
 0x160   : > { %910 = vadd.xlane.f32.xlu1 %v909_v52  ;;  %v1013_v59 = vpop.f32.mrf.mxu0  ;;  %v1033_v61 = vpop.f32.mrf.mxu1 }
 0x165   : > { %v963_v54 = vpop.f32.mrf.mxu2  ;;  %v983_v55 = vpop.f32.mrf.mxu3 }
 0x166   : > { %v1014_v44 = vadd.f32 %v1013_v59, %v963_v54  ;;  %v1034_v62 = vadd.f32 %v1033_v61, %v983_v55 }
 0x175   : > { %v1082_v56 = vpop.f32.mrf.mxu2  ;;  %v1102_v58 = vpop.f32.mrf.mxu3 }
 0x176   : > { %v1105_v5 = vadd.f32 %v1082_v56, %v1014_v44  ;;  %v1106_v6 = vadd.f32 %v1102_v58, %v1034_v62 }
 0x177   : > { %v1153_v3 = vpop.f32.mrf.mxu0  ;;  %v1173_v4 = vpop.f32.mrf.mxu1 }
 0x178   : > { %v1176_v7 = vadd.f32 %v1153_v3, %v1105_v5  ;;  %v1177_v31 = vadd.f32 %v1173_v4, %v1106_v6 }
 0x185   : > { %v1224_v63 = vpop.f32.mrf.mxu2  ;;  %v1244_v0 = vpop.f32.mrf.mxu3 }
 0x186   : > { %v1247_v24 = vadd.f32 %v1224_v63, %v1176_v7  ;;  %v1248_v25 = vadd.f32 %v1244_v0, %v1177_v31 }
 0x195   : > { %v1366_v8 = vpop.f32.mrf.mxu2  ;;  %v1386_v9 = vpop.f32.mrf.mxu3 }
 0x198   : > { %v1295_v10 = vpop.f32.mrf.mxu0  ;;  %v1315_v11 = vpop.f32.mrf.mxu1 }
 0x199   : > { %v1318_v12 = vadd.f32 %v1295_v10, %v1247_v24  ;;  %v1319_v2 = vadd.f32 %v1315_v11, %v1248_v25 }
 0x19b   : > { %v1389_v13 = vadd.f32 %v1366_v8, %v1318_v12  ;;  %v1390_v14 = vadd.f32 %v1386_v9, %v1319_v2 }
 0x1a5   : > { %v1508_v15 = vpop.f32.mrf.mxu2  ;;  %v1528_v57 = vpop.f32.mrf.mxu3 }
 0x1a7   : > { %v1437_v16 = vpop.f32.mrf.mxu0  ;;  %v1457_v37 = vpop.f32.mrf.mxu1 }
 0x1a8   : > { %v1460_v17 = vadd.f32 %v1437_v16, %v1389_v13  ;;  %v1461_v42 = vadd.f32 %v1457_v37, %v1390_v14 }
 0x1aa   : > { %v1531_v19 = vadd.f32 %v1508_v15, %v1460_v17  ;;  %v1532_v21 = vadd.f32 %v1528_v57, %v1461_v42 }
 0x1ac   : > { %v1533_v22 = vadd.f32 %v1531_v19, %v893_v47  ;;  %v1534_v23 = vadd.f32 %v1532_v21, %v893_v47 }
 0x1ae   : > { %1845 = vst [vmem:[#allocation4 + $0x18] sm:$0xff] %v1533_v22  ;;  %v1541_v26 = vadd.f32 %v1534_v23, %v1533_v22  ;;  %v1545_v27 = vmul.f32 %v1533_v22, %v1533_v22  ;;  %v1546_v28 = vmul.f32 %v1534_v23, %v1534_v23 }
 0x1af   : > { %1846 = vst [vmem:[#allocation4 + $0x8] sm:$0xff] %v1534_v23 }
 0x1b0   : > { %1542 = vadd.xlane.f32.xlu2 %v1541_v26  ;;  %v1547_v29 = vadd.f32 %v1546_v28, %v1545_v27 }
 0x1b8   : > { %1548 = vadd.xlane.f32.xlu2 %v1547_v29 }
 0x1d1   : > { %v905_v30 = vpop.xlane.xlu0 %904 }
 0x1d3   : > { %v911_v34 = vpop.xlane.xlu1 %910 }
 0x223   : > { %v1543_v53 = vpop.xlane.xlu2 %1542 }
 0x224   : > { %v1544_v32 = vadd.f32 %v1543_v53, %v905_v30 }
 0x226   : > { %v1552_v33 = vadd.f32 %v1551_v60, %v1544_v32 }
 0x228   : > { %1554 = vst.msk [vmem:[#allocation2] sm:$0xff] %vm1553_vm11, %v1552_v33 }
 0x22b   : > { %v1549_v36 = vpop.xlane.xlu2 %1548 }
 0x22c   : > { %v1550_v38 = vadd.f32 %v1549_v36, %v911_v34 }
 0x22e   : > { %v1556_v39 = vadd.f32 %v1555_v35, %v1550_v38 }
 0x230   : > { %1557 = vst.msk [vmem:[#allocation3] sm:$0xff] %vm1553_vm11, %v1556_v39 }
 0x231 PF: > { %p1847_p6 = scmp.ne.s32.totalorder %s1959_s15, 1 }
 0x233   : > { %1561 = sbr.rel (%p1847_p6) target bundleno = 738 (0x2e2), region = 48 }
 0x238   : > { %v1565_v40 = vld [vmem:[#allocation2] sm:$0xff]  ;;  %v1567_v1 = vld [vmem:[#allocation3] sm:$0xff]  ;;  %v1979_v18 = vmov 0   ;;  %vm1586_vm15 = vcmask 7168   ;;  %v1600_v4 = vld [vmem:[#allocation4] sm:$0xff] }
 0x239   : > { %1910 = vset.pattern.permute.xlu0 %v1979_v18  ;;  %v1566_v41 = vmul.f32 0.001953125, %v1565_v40  ;;  %v1568_v43 = vmul.f32 0.001953125, %v1567_v1  ;;  %v1848_v54 = vld [vmem:[%s2401_s3 + $0x8] sm:$0xff]  ;;  %v1849_v59 = vld [vmem:[%s2401_s3 + $0x10] sm:$0xff]  ;;  %v1851_v6 = vld [vmem:[#allocation4 + $0x8] sm:$0xff] }
 0x23a   : > { %v1599_v3 = vld [vmem:[#allocation4 + $0x10] sm:$0xff]  ;;  %v1850_v5 = vld [vmem:[#allocation4 + $0x18] sm:$0xff] }
 0x23b   : > { %v1569_v45 = vmul.f32 %v1566_v41, %v1566_v41 }
 0x23d   : > { %v1570_v46 = vsub.f32 %v1568_v43, %v1569_v45 }
 0x23f   : > { %v1571_v47 = vmax.f32 %v1570_v46, 0.0 }
 0x241   : > { %v1574_v48 = vadd.f32 1e-05, %v1571_v47 }
 0x243   : > { %1911 = vrsqrt.f32 %v1574_v48  ;;  %vm1581_vm12 = vweird.f32 %v1574_v48 }
 0x249   : > { %v1912_v49 = vpop.eup %1911 }
 0x24a   : > { %v1576_v20 = vmul.f32 %v1912_v49, %v1574_v48  ;;  %vm1582_vm13 = vweird.f32 %v1912_v49 }
 0x24b   : > { %vm1583_vm14 = vmor %vm1581_vm12, %vm1582_vm13 }
 0x24c   : > { %v1577_v50 = vmul.f32 %v1912_v49, %v1576_v20 }
 0x24e   : > { %v1578_v51 = vmul.f32 0.5, %v1577_v50 }
 0x250   : > { %v1579_v52 = vsub.f32 1.5, %v1578_v51 }
 0x252   : > { %v1580_v55 = vmul.f32 %v1912_v49, %v1579_v52 }
 0x254   : > { %v1584_v56 = vsel %vm1583_vm14, %v1912_v49, %v1580_v55 }
 0x255   : > { %v1585_v58 = vmul.f32 %v1848_v54, %v1584_v56 }
 0x257   : > { %1587 = vst.msk [vmem:[#allocation2] sm:$0xff] %vm1586_vm15, %v1585_v58  ;;  %v1590_v61 = vmul.f32 %v1585_v58, %v1566_v41 }
 0x259   : > { %v1591_v44 = vsub.f32 %v1849_v59, %v1590_v61 }
 0x25b   : > { %1592 = vst.msk [vmem:[#allocation3] sm:$0xff] %vm1586_vm15, %v1591_v44 }
 0x25e   : > { %v1593_v62 = vld [vmem:[#allocation2] sm:$0xff] }
 0x25f   : > { %1603 = vperm.xlu0 %1910, %v1593_v62  }
 0x262   : > { %v1594_v63 = vld [vmem:[#allocation3] sm:$0xff] }
 0x267   : > { %1610 = vperm.xlu0 %1910, %v1594_v63  }
 0x2d1   : > { %v1604_v0 = vpop.permute.xlu0 %1603 }
 0x2d2   : > { %v1606_v7 = vmul.f32 %v1604_v0, %v1599_v3  ;;  %v1607_v31 = vmul.f32 %v1604_v0, %v1600_v4  ;;  %v1625_v8 = vmul.f32 %v1850_v5, %v1604_v0  ;;  %v1626_v9 = vmul.f32 %v1851_v6, %v1604_v0 }
 0x2d9   : > { %v1611_v10 = vpop.permute.xlu0 %1610 }
 0x2da   : > { %v1613_v11 = vadd.f32 %v1611_v10, %v1606_v7  ;;  %v1614_v24 = vadd.f32 %v1611_v10, %v1607_v31  ;;  %v1627_v25 = vadd.f32 %v1625_v8, %v1611_v10  ;;  %v1628_v12 = vadd.f32 %v1626_v9, %v1611_v10 }
 0x2dc   : > { %v1615_v2 = vmax.f32 %v1613_v11, 0.0  ;;  %v1616_v13 = vmax.f32 %v1614_v24, 0.0  ;;  %v1629_v14 = vmax.f32 %v1627_v25, 0.0  ;;  %v1630_v15 = vmax.f32 %v1628_v12, 0.0 }
 0x2de   : > { %1617 = vst [vmem:[#allocation5] sm:$0xff] %v1615_v2 }
 0x2df   : > { %1618 = vst [vmem:[#allocation5 + $0x8] sm:$0xff] %v1616_v13 }
 0x2e0   : > { %1852 = vst [vmem:[#allocation5 + $0x10] sm:$0xff] %v1629_v14 }
 0x2e1   : > { %1853 = vst [vmem:[#allocation5 + $0x18] sm:$0xff] %v1630_v15 }
 0x2e2 PF: > { %p1867_p7 = scmp.eq.s32.totalorder %s1734_s18, 1  ;;  %s1651_s30 = sshll.u32 %s2402_s4, 4  ;;  %s1652_s30 = int_to_ptr.hbm [resolvable:$true] %s1651_s30 }
 0x2e3   : > { %s1980_s5 = smov [#allocation5]   ;;  %s1981_s7 = smov 256  }
 0x2e4   : > { %s1649_s6 = sshll.u32 %s1980_s5, 4  ;;  %s1982_s8 = smov 16   ;;  %s1650_s6 = int_to_ptr.vmem [resolvable:$true] %s1649_s6 }
 0x2e5   : > { %1860 = dma.vmem_to_hbm [thread:$0]  (%p1867_p7), %s1650_s6, 512, %s1652_s30, [#allocation6], %s1981_s7, %s1981_s7, %s1982_s8  }
 0x2e6 PF: > { %p1868_p8 = scmp.ge.s32.totalorder %s1967_s17, 2  ;;  %p1869_p9 = scmp.eq.s32.totalorder %s1735_s19, 1 }
 0x2e8   : > { %p1864_p10 = pnand %p1869_p9, %p1868_p8 }
 0x2ea   : > { %p1865_p11 = pneg %p1864_p10 }
 0x2ec   : > { %1954 = dma.done.wait (%p1865_p11), [#allocation6], 512  }
 0x2ed   : > { %1956 = vsyncadd (%p1865_p11), [#allocation6], 4294966784  ;;  %s17_s17 = sadd.s32 1, %s1967_s17   ;;  %s2403_s15 = smov %s1963_s16 }
 0x2ee   : > { %p14_p12 = scmp.ge.s32.totalorder %s17_s17, 4   ;;  %s2404_s16 = smov %s2406_s20 }
 0x2f0   :  { %16 = sbr.rel (!%p14_p12) target bundleno = 3 (0x3), region = 110 }
 0x2f5   :  { %1673 = vsyncpa [#allocation6], 1 }
 0x2f6   :  { %1675 = vsyncpa [#allocation6 + $0x1], 1 }

</bundles_post_ra>
